<compile_context>
chip_gen: v7x
topology: tpu7x:2x2x1
jax: 0.10.0
libtpu: 0.0.40
codegen_flags: <defaults>
</compile_context>

<pallas_src>
import jax
import jax.numpy as jnp
from jax.experimental import pallas as pl
from jax.experimental.pallas import tpu as pltpu

REACTION_TIME = 10
HIDDEN_SIZE = 100
INPUT_SIZE = 3
ACTION_HIGH = 20.0


def actor_kernel(obs_ref,      # (T*B, I)   time-major flattened observations
                 wx_ref,       # (I, H)     RNN input weights (pre-transposed)
                 wh_ref,       # (H, H)     RNN recurrent weights (pre-transposed)
                 b_rnn_ref,    # (1, H)     b_ih + b_hh
                 wa1h_ref,     # (H, H)     attn wa1, hidden/query half, transposed
                 wa1e_ref,     # (H, H)     attn wa1, encoder half, transposed
                 ba1_ref,      # (1, H)
                 wa2_ref,      # (1, H)     attn wa2 row
                 ba2_ref,      # (1, 1)
                 wo_ref,       # (1, H)     output head row
                 bo_ref,       # (1, 1)
                 x_ref,        # out: (B, 1)
                 en_ref):      # out: (B, T) softmax attention weights
    B = x_ref.shape[0]
    T = en_ref.shape[1]
    H = wh_ref.shape[0]
    f32 = jnp.float32

    wh = wh_ref[...]

    # --- hoisted input projection: one matmul, off the serial chain ---
    xp = (jnp.dot(obs_ref[...], wx_ref[...], preferred_element_type=f32)
          + b_rnn_ref[...])                                              # (T*B, H)

    # --- serial RNN recurrence (T is small & static -> fully unrolled) ---
    # per-step body is just h = tanh(xp[t] + h @ wh)
    h = jnp.zeros((B, H), f32)
    hs = []
    for t in range(T):
        h = jnp.tanh(xp[t * B:(t + 1) * B, :]
                     + jnp.dot(h, wh, preferred_element_type=f32))
        hs.append(h)

    # stack hidden states batch-major: (B, T, H) and (B*T, H)
    hs3 = jnp.stack(hs, axis=1)
    hs_flat = hs3.reshape(B * T, H)

    # --- attention: softmax_t( wa2( tanh( wa1([hidden_T ; h_t]) ) ) ) ---
    # query term (final hidden state) computed once; encoder term batched.
    e1 = jnp.dot(h, wa1h_ref[...], preferred_element_type=f32) + ba1_ref[...]  # (B, H)
    a_pre = jnp.dot(hs_flat, wa1e_ref[...], preferred_element_type=f32)        # (B*T, H)
    a3 = jnp.tanh(a_pre.reshape(B, T, H) + e1[:, None, :])                     # (B, T, H)

    # wa2 projection: VPU multiply + lane reduce (skip an N=1 MXU push)
    e_bt = jnp.sum(a3 * wa2_ref[...].reshape(1, 1, H), axis=-1) + ba2_ref[...]  # (B, T)

    # softmax over T on a single (B, T) tile
    m = jnp.max(e_bt, axis=-1, keepdims=True)
    ex = jnp.exp(e_bt - m)
    alphas = ex / jnp.sum(ex, axis=-1, keepdims=True)                          # (B, T)
    en_ref[...] = alphas                                                       # single store

    # --- context = attention-weighted sum of hidden states, then head ---
    context = jnp.sum(alphas[:, :, None] * hs3, axis=1)                        # (B, H)
    out = jnp.sum(context * wo_ref[...], axis=-1, keepdims=True) + bo_ref[...]  # (B, 1)
    x_ref[...] = jnp.tanh(out) * ACTION_HIGH


def prepare_params(params):
    """One-time transposes / reshapes so per-call work is only the kernel."""
    H = HIDDEN_SIZE
    return {
        "wx": params["w_ih"].T,                                   # (I, H)
        "wh": params["w_hh"].T,                                   # (H, H)
        "b_rnn": (params["b_ih"] + params["b_hh"]).reshape(1, H),  # (1, H)
        "wa1h": params["wa1_w"][:, :H].T,                         # (H, H) hidden half
        "wa1e": params["wa1_w"][:, H:].T,                         # (H, H) encoder half
        "ba1": params["wa1_b"].reshape(1, H),                     # (1, H)
        "wa2": params["wa2_w"].reshape(1, H),                     # (1, H)
        "ba2": params["wa2_b"].reshape(1, 1),                     # (1, 1)
        "wo": params["out_w"].reshape(1, H),                      # (1, H)
        "bo": params["out_b"].reshape(1, 1),                      # (1, 1)
    }


@jax.jit
def actor_forward(obs, kp):
    B, T, I = obs.shape
    # time-major flatten so xp rows for step t are contiguous: row t*B + b
    obs_tm = jnp.transpose(obs, (1, 0, 2)).reshape(T * B, I)

    kernel_inputs = (
        obs_tm,
        kp["wx"], kp["wh"], kp["b_rnn"],
        kp["wa1h"], kp["wa1e"], kp["ba1"],
        kp["wa2"], kp["ba2"],
        kp["wo"], kp["bo"],
    )

    vmem_spec = lambda: pl.BlockSpec(memory_space=pltpu.MemorySpace.VMEM)

    x, alphas = pl.pallas_call(
        actor_kernel,
        out_shape=(
            jax.ShapeDtypeStruct((B, 1), jnp.float32),
            jax.ShapeDtypeStruct((B, T), jnp.float32),
        ),
        in_specs=[vmem_spec() for _ in kernel_inputs],
        out_specs=(vmem_spec(), vmem_spec()),
    )(*kernel_inputs)

    # energies in the PyTorch module are (B, 1, T) (softmax(dim=1).permute(0,2,1))
    return x, alphas.reshape(B, 1, T)


def init_params(key):
    """Deterministic parameter init matching the PyTorch module's shapes."""
    H, I = HIDDEN_SIZE, INPUT_SIZE
    ks = jax.random.split(key, 10)
    k_rnn = 1.0 / jnp.sqrt(H)

    def xavier(k, shape):
        fan_out, fan_in = shape
        std = jnp.sqrt(2.0 / (fan_in + fan_out))
        return std * jax.random.normal(k, shape, jnp.float32)

    return {
        # nn.RNN(input_size=3, hidden_size=H, num_layers=1): default uniform init
        "w_ih": jax.random.uniform(ks[0], (H, I), jnp.float32, -k_rnn, k_rnn),
        "w_hh": jax.random.uniform(ks[1], (H, H), jnp.float32, -k_rnn, k_rnn),
        "b_ih": jax.random.uniform(ks[2], (H,), jnp.float32, -k_rnn, k_rnn),
        "b_hh": jax.random.uniform(ks[3], (H,), jnp.float32, -k_rnn, k_rnn),
        # Attn: wa1 (H, 2H) xavier_normal, bias uniform(0,1); wa2 (1, H)
        "wa1_w": xavier(ks[4], (H, 2 * H)),
        "wa1_b": jax.random.uniform(ks[5], (H,), jnp.float32, 0.0, 1.0),
        "wa2_w": xavier(ks[6], (1, H)),
        "wa2_b": jax.random.uniform(ks[7], (1,), jnp.float32, 0.0, 1.0),
        # out: Linear(H, 1) xavier_normal, bias uniform(0,1)
        "out_w": xavier(ks[8], (1, H)),
        "out_b": jax.random.uniform(ks[9], (1,), jnp.float32, 0.0, 1.0),
    }


def actor_forward_ref(obs, params):
    """Pure-JAX reference mirroring the PyTorch forward, for validation."""
    B, T, _ = obs.shape
    H = HIDDEN_SIZE
    h = jnp.zeros((B, H), jnp.float32)
    hs = []
    for t in range(T):
        h = jnp.tanh(obs[:, t, :] @ params["w_ih"].T + params["b_ih"]
                     + h @ params["w_hh"].T + params["b_hh"])
        hs.append(h)
    r_out = jnp.stack(hs, axis=1)                                   # (B, T, H)
    hidden_rep = jnp.broadcast_to(h[:, None, :], (B, T, H))
    h_cat = jnp.concatenate([hidden_rep, r_out], axis=2)            # (B, T, 2H)
    a = jnp.tanh(h_cat @ params["wa1_w"].T + params["wa1_b"])
    e = a @ params["wa2_w"].T + params["wa2_b"]                     # (B, T, 1)
    alpha = jax.nn.softmax(e, axis=1)
    energies = jnp.transpose(alpha, (0, 2, 1))                      # (B, 1, T)
    context = jnp.einsum("bot,bth->boh", energies, r_out)           # (B, 1, H)
    out = context[:, 0, :] @ params["out_w"].T + params["out_b"]    # (B, 1)
    return jnp.tanh(out) * ACTION_HIGH, energies


if __name__ == "__main__":
    key = jax.random.PRNGKey(0)
    k_param, k_obs = jax.random.split(key)

    B, T, I = 2, REACTION_TIME, INPUT_SIZE
    params = init_params(k_param)
    kernel_params = prepare_params(params)          # one-time transposes/reshapes
    obs = jax.random.normal(k_obs, (B, T, I), jnp.float32)

    x, energies = actor_forward(obs, kernel_params)
    jax.block_until_ready((x, energies))

    x_ref, energies_ref = actor_forward_ref(obs, params)
    assert x.shape == (B, 1) and energies.shape == (B, 1, T)
    assert jnp.allclose(x, x_ref, atol=1e-4, rtol=1e-4)
    assert jnp.allclose(energies, energies_ref, atol=1e-5, rtol=1e-4)

    print("KERNEL_OK")
</pallas_src>

<mosaic_0001>
module attributes {stable_mosaic.version = 11 : i64} {
  func.func @actor_kernel(%arg0: memref<20x3xf32, #tpu.memory_space<vmem>>, %arg1: memref<3x100xf32, #tpu.memory_space<vmem>>, %arg2: memref<100x100xf32, #tpu.memory_space<vmem>>, %arg3: memref<1x100xf32, #tpu.memory_space<vmem>>, %arg4: memref<100x100xf32, #tpu.memory_space<vmem>>, %arg5: memref<100x100xf32, #tpu.memory_space<vmem>>, %arg6: memref<1x100xf32, #tpu.memory_space<vmem>>, %arg7: memref<1x100xf32, #tpu.memory_space<vmem>>, %arg8: memref<1x1xf32, #tpu.memory_space<vmem>>, %arg9: memref<1x100xf32, #tpu.memory_space<vmem>>, %arg10: memref<1x1xf32, #tpu.memory_space<vmem>>, %arg11: memref<2x1xf32, #tpu.memory_space<vmem>>, %arg12: memref<2x10xf32, #tpu.memory_space<vmem>>) attributes {dimension_semantics = [], scalar_prefetch = 0 : i64, scratch_operands = 0 : i64, tpu.core_type = #tpu.core_type<tc>} {
    %c0 = arith.constant 0 : index
    %c0_0 = arith.constant 0 : index
    %0 = vector.load %arg2[%c0, %c0_0] : memref<100x100xf32, #tpu.memory_space<vmem>>, vector<100x100xf32>
    %c0_1 = arith.constant 0 : index
    %c0_2 = arith.constant 0 : index
    %1 = vector.load %arg0[%c0_1, %c0_2] : memref<20x3xf32, #tpu.memory_space<vmem>>, vector<20x3xf32>
    %c0_3 = arith.constant 0 : index
    %c0_4 = arith.constant 0 : index
    %2 = vector.load %arg1[%c0_3, %c0_4] : memref<3x100xf32, #tpu.memory_space<vmem>>, vector<3x100xf32>
    %cst = arith.constant dense<0.000000e+00> : vector<20x100xf32>
    %3 = tpu.matmul %1, %2, %cst {dimension_numbers = #tpu.dot_dimension_numbers<[1], [0], [0], [1], [0, 0, 1, 1], [], []>} : vector<20x3xf32>, vector<3x100xf32>, vector<20x100xf32> -> vector<20x100xf32>
    %c0_5 = arith.constant 0 : index
    %c0_6 = arith.constant 0 : index
    %4 = vector.load %arg3[%c0_5, %c0_6] : memref<1x100xf32, #tpu.memory_space<vmem>>, vector<1x100xf32>
    %5 = vector.broadcast %4 : vector<1x100xf32> to vector<20x100xf32>
    %6 = arith.addf %3, %5 : vector<20x100xf32>
    %cst_7 = arith.constant 0.000000e+00 : f32
    %7 = vector.broadcast %cst_7 : f32 to vector<2x100xf32>
    %8 = vector.extract_strided_slice %6 {offsets = [0, 0], sizes = [2, 100], strides = [1, 1]} : vector<20x100xf32> to vector<2x100xf32>
    %cst_8 = arith.constant dense<0.000000e+00> : vector<2x100xf32>
    %9 = tpu.matmul %7, %0, %cst_8 {dimension_numbers = #tpu.dot_dimension_numbers<[1], [0], [0], [1], [0, 0, 1, 1], [], []>} : vector<2x100xf32>, vector<100x100xf32>, vector<2x100xf32> -> vector<2x100xf32>
    %10 = arith.addf %8, %9 : vector<2x100xf32>
    %11 = math.tanh %10 : vector<2x100xf32>
    %12 = vector.extract_strided_slice %6 {offsets = [2, 0], sizes = [2, 100], strides = [1, 1]} : vector<20x100xf32> to vector<2x100xf32>
    %cst_9 = arith.constant dense<0.000000e+00> : vector<2x100xf32>
    %13 = tpu.matmul %11, %0, %cst_9 {dimension_numbers = #tpu.dot_dimension_numbers<[1], [0], [0], [1], [0, 0, 1, 1], [], []>} : vector<2x100xf32>, vector<100x100xf32>, vector<2x100xf32> -> vector<2x100xf32>
    %14 = arith.addf %12, %13 : vector<2x100xf32>
    %15 = math.tanh %14 : vector<2x100xf32>
    %16 = vector.extract_strided_slice %6 {offsets = [4, 0], sizes = [2, 100], strides = [1, 1]} : vector<20x100xf32> to vector<2x100xf32>
    %cst_10 = arith.constant dense<0.000000e+00> : vector<2x100xf32>
    %17 = tpu.matmul %15, %0, %cst_10 {dimension_numbers = #tpu.dot_dimension_numbers<[1], [0], [0], [1], [0, 0, 1, 1], [], []>} : vector<2x100xf32>, vector<100x100xf32>, vector<2x100xf32> -> vector<2x100xf32>
    %18 = arith.addf %16, %17 : vector<2x100xf32>
    %19 = math.tanh %18 : vector<2x100xf32>
    %20 = vector.extract_strided_slice %6 {offsets = [6, 0], sizes = [2, 100], strides = [1, 1]} : vector<20x100xf32> to vector<2x100xf32>
    %cst_11 = arith.constant dense<0.000000e+00> : vector<2x100xf32>
    %21 = tpu.matmul %19, %0, %cst_11 {dimension_numbers = #tpu.dot_dimension_numbers<[1], [0], [0], [1], [0, 0, 1, 1], [], []>} : vector<2x100xf32>, vector<100x100xf32>, vector<2x100xf32> -> vector<2x100xf32>
    %22 = arith.addf %20, %21 : vector<2x100xf32>
    %23 = math.tanh %22 : vector<2x100xf32>
    %24 = vector.extract_strided_slice %6 {offsets = [8, 0], sizes = [2, 100], strides = [1, 1]} : vector<20x100xf32> to vector<2x100xf32>
    %cst_12 = arith.constant dense<0.000000e+00> : vector<2x100xf32>
    %25 = tpu.matmul %23, %0, %cst_12 {dimension_numbers = #tpu.dot_dimension_numbers<[1], [0], [0], [1], [0, 0, 1, 1], [], []>} : vector<2x100xf32>, vector<100x100xf32>, vector<2x100xf32> -> vector<2x100xf32>
    %26 = arith.addf %24, %25 : vector<2x100xf32>
    %27 = math.tanh %26 : vector<2x100xf32>
    %28 = vector.extract_strided_slice %6 {offsets = [10, 0], sizes = [2, 100], strides = [1, 1]} : vector<20x100xf32> to vector<2x100xf32>
    %cst_13 = arith.constant dense<0.000000e+00> : vector<2x100xf32>
    %29 = tpu.matmul %27, %0, %cst_13 {dimension_numbers = #tpu.dot_dimension_numbers<[1], [0], [0], [1], [0, 0, 1, 1], [], []>} : vector<2x100xf32>, vector<100x100xf32>, vector<2x100xf32> -> vector<2x100xf32>
    %30 = arith.addf %28, %29 : vector<2x100xf32>
    %31 = math.tanh %30 : vector<2x100xf32>
    %32 = vector.extract_strided_slice %6 {offsets = [12, 0], sizes = [2, 100], strides = [1, 1]} : vector<20x100xf32> to vector<2x100xf32>
    %cst_14 = arith.constant dense<0.000000e+00> : vector<2x100xf32>
    %33 = tpu.matmul %31, %0, %cst_14 {dimension_numbers = #tpu.dot_dimension_numbers<[1], [0], [0], [1], [0, 0, 1, 1], [], []>} : vector<2x100xf32>, vector<100x100xf32>, vector<2x100xf32> -> vector<2x100xf32>
    %34 = arith.addf %32, %33 : vector<2x100xf32>
    %35 = math.tanh %34 : vector<2x100xf32>
    %36 = vector.extract_strided_slice %6 {offsets = [14, 0], sizes = [2, 100], strides = [1, 1]} : vector<20x100xf32> to vector<2x100xf32>
    %cst_15 = arith.constant dense<0.000000e+00> : vector<2x100xf32>
    %37 = tpu.matmul %35, %0, %cst_15 {dimension_numbers = #tpu.dot_dimension_numbers<[1], [0], [0], [1], [0, 0, 1, 1], [], []>} : vector<2x100xf32>, vector<100x100xf32>, vector<2x100xf32> -> vector<2x100xf32>
    %38 = arith.addf %36, %37 : vector<2x100xf32>
    %39 = math.tanh %38 : vector<2x100xf32>
    %40 = vector.extract_strided_slice %6 {offsets = [16, 0], sizes = [2, 100], strides = [1, 1]} : vector<20x100xf32> to vector<2x100xf32>
    %cst_16 = arith.constant dense<0.000000e+00> : vector<2x100xf32>
    %41 = tpu.matmul %39, %0, %cst_16 {dimension_numbers = #tpu.dot_dimension_numbers<[1], [0], [0], [1], [0, 0, 1, 1], [], []>} : vector<2x100xf32>, vector<100x100xf32>, vector<2x100xf32> -> vector<2x100xf32>
    %42 = arith.addf %40, %41 : vector<2x100xf32>
    %43 = math.tanh %42 : vector<2x100xf32>
    %44 = vector.extract_strided_slice %6 {offsets = [18, 0], sizes = [2, 100], strides = [1, 1]} : vector<20x100xf32> to vector<2x100xf32>
    %cst_17 = arith.constant dense<0.000000e+00> : vector<2x100xf32>
    %45 = tpu.matmul %43, %0, %cst_17 {dimension_numbers = #tpu.dot_dimension_numbers<[1], [0], [0], [1], [0, 0, 1, 1], [], []>} : vector<2x100xf32>, vector<100x100xf32>, vector<2x100xf32> -> vector<2x100xf32>
    %46 = arith.addf %44, %45 : vector<2x100xf32>
    %47 = math.tanh %46 : vector<2x100xf32>
    %48 = vector.shape_cast %11 : vector<2x100xf32> to vector<2x1x100xf32>
    %49 = vector.shape_cast %15 : vector<2x100xf32> to vector<2x1x100xf32>
    %50 = vector.shape_cast %19 : vector<2x100xf32> to vector<2x1x100xf32>
    %51 = vector.shape_cast %23 : vector<2x100xf32> to vector<2x1x100xf32>
    %52 = vector.shape_cast %27 : vector<2x100xf32> to vector<2x1x100xf32>
    %53 = vector.shape_cast %31 : vector<2x100xf32> to vector<2x1x100xf32>
    %54 = vector.shape_cast %35 : vector<2x100xf32> to vector<2x1x100xf32>
    %55 = vector.shape_cast %39 : vector<2x100xf32> to vector<2x1x100xf32>
    %56 = vector.shape_cast %43 : vector<2x100xf32> to vector<2x1x100xf32>
    %57 = vector.shape_cast %47 : vector<2x100xf32> to vector<2x1x100xf32>
    %58 = tpu.concatenate %48, %49, %50, %51, %52, %53, %54, %55, %56, %57 in 1 : vector<2x1x100xf32>, vector<2x1x100xf32>, vector<2x1x100xf32>, vector<2x1x100xf32>, vector<2x1x100xf32>, vector<2x1x100xf32>, vector<2x1x100xf32>, vector<2x1x100xf32>, vector<2x1x100xf32>, vector<2x1x100xf32> -> vector<2x10x100xf32>
    %59 = vector.shape_cast %58 : vector<2x10x100xf32> to vector<20x100xf32>
    %c0_18 = arith.constant 0 : index
    %c0_19 = arith.constant 0 : index
    %60 = vector.load %arg4[%c0_18, %c0_19] : memref<100x100xf32, #tpu.memory_space<vmem>>, vector<100x100xf32>
    %cst_20 = arith.constant dense<0.000000e+00> : vector<2x100xf32>
    %61 = tpu.matmul %47, %60, %cst_20 {dimension_numbers = #tpu.dot_dimension_numbers<[1], [0], [0], [1], [0, 0, 1, 1], [], []>} : vector<2x100xf32>, vector<100x100xf32>, vector<2x100xf32> -> vector<2x100xf32>
    %c0_21 = arith.constant 0 : index
    %c0_22 = arith.constant 0 : index
    %62 = vector.load %arg6[%c0_21, %c0_22] : memref<1x100xf32, #tpu.memory_space<vmem>>, vector<1x100xf32>
    %63 = vector.broadcast %62 : vector<1x100xf32> to vector<2x100xf32>
    %64 = arith.addf %61, %63 : vector<2x100xf32>
    %c0_23 = arith.constant 0 : index
    %c0_24 = arith.constant 0 : index
    %65 = vector.load %arg5[%c0_23, %c0_24] : memref<100x100xf32, #tpu.memory_space<vmem>>, vector<100x100xf32>
    %cst_25 = arith.constant dense<0.000000e+00> : vector<20x100xf32>
    %66 = tpu.matmul %59, %65, %cst_25 {dimension_numbers = #tpu.dot_dimension_numbers<[1], [0], [0], [1], [0, 0, 1, 1], [], []>} : vector<20x100xf32>, vector<100x100xf32>, vector<20x100xf32> -> vector<20x100xf32>
    %67 = vector.shape_cast %66 : vector<20x100xf32> to vector<2x10x100xf32>
    %68 = vector.shape_cast %64 : vector<2x100xf32> to vector<2x1x100xf32>
    %69 = vector.broadcast %68 : vector<2x1x100xf32> to vector<2x10x100xf32>
    %70 = arith.addf %67, %69 : vector<2x10x100xf32>
    %71 = math.tanh %70 : vector<2x10x100xf32>
    %c0_26 = arith.constant 0 : index
    %c0_27 = arith.constant 0 : index
    %72 = vector.load %arg7[%c0_26, %c0_27] : memref<1x100xf32, #tpu.memory_space<vmem>>, vector<1x100xf32>
    %73 = vector.shape_cast %72 : vector<1x100xf32> to vector<1x1x100xf32>
    %74 = vector.broadcast %73 : vector<1x1x100xf32> to vector<2x10x100xf32>
    %75 = arith.mulf %71, %74 : vector<2x10x100xf32>
    %cst_28 = arith.constant dense<0.000000e+00> : vector<2x10xf32>
    %76 = vector.multi_reduction <add>, %75, %cst_28 [2] : vector<2x10x100xf32> to vector<2x10xf32>
    %c0_29 = arith.constant 0 : index
    %c0_30 = arith.constant 0 : index
    %77 = vector.load %arg8[%c0_29, %c0_30] : memref<1x1xf32, #tpu.memory_space<vmem>>, vector<1x1xf32>
    %78 = vector.broadcast %77 : vector<1x1xf32> to vector<2x10xf32>
    %79 = arith.addf %76, %78 : vector<2x10xf32>
    %cst_31 = arith.constant dense<0xFF800000> : vector<2xf32>
    %80 = vector.multi_reduction <maximumf>, %79, %cst_31 [1] : vector<2x10xf32> to vector<2xf32>
    %81 = vector.shape_cast %80 : vector<2xf32> to vector<2x1xf32>
    %82 = vector.broadcast %81 : vector<2x1xf32> to vector<2x10xf32>
    %83 = arith.subf %79, %82 : vector<2x10xf32>
    %84 = math.exp %83 : vector<2x10xf32>
    %cst_32 = arith.constant dense<0.000000e+00> : vector<2xf32>
    %85 = vector.multi_reduction <add>, %84, %cst_32 [1] : vector<2x10xf32> to vector<2xf32>
    %86 = vector.shape_cast %85 : vector<2xf32> to vector<2x1xf32>
    %87 = vector.broadcast %86 : vector<2x1xf32> to vector<2x10xf32>
    %88 = arith.divf %84, %87 : vector<2x10xf32>
    %c0_33 = arith.constant 0 : index
    %c0_34 = arith.constant 0 : index
    %89 = vector.load %arg12[%c0_33, %c0_34] : memref<2x10xf32, #tpu.memory_space<vmem>>, vector<2x10xf32>
    tpu.vector_store %arg12[%c0_33, %c0_34], %88 {strides = array<i32>} : memref<2x10xf32, #tpu.memory_space<vmem>>, vector<2x10xf32>,
    %90 = vector.shape_cast %88 : vector<2x10xf32> to vector<2x10x1xf32>
    %91 = vector.broadcast %90 : vector<2x10x1xf32> to vector<2x10x100xf32>
    %92 = arith.mulf %91, %58 : vector<2x10x100xf32>
    %cst_35 = arith.constant dense<0.000000e+00> : vector<2x100xf32>
    %93 = vector.multi_reduction <add>, %92, %cst_35 [1] : vector<2x10x100xf32> to vector<2x100xf32>
    %c0_36 = arith.constant 0 : index
    %c0_37 = arith.constant 0 : index
    %94 = vector.load %arg9[%c0_36, %c0_37] : memref<1x100xf32, #tpu.memory_space<vmem>>, vector<1x100xf32>
    %95 = vector.broadcast %94 : vector<1x100xf32> to vector<2x100xf32>
    %96 = arith.mulf %93, %95 : vector<2x100xf32>
    %cst_38 = arith.constant dense<0.000000e+00> : vector<2xf32>
    %97 = vector.multi_reduction <add>, %96, %cst_38 [1] : vector<2x100xf32> to vector<2xf32>
    %98 = vector.shape_cast %97 : vector<2xf32> to vector<2x1xf32>
    %c0_39 = arith.constant 0 : index
    %c0_40 = arith.constant 0 : index
    %99 = vector.load %arg10[%c0_39, %c0_40] : memref<1x1xf32, #tpu.memory_space<vmem>>, vector<1x1xf32>
    %100 = vector.broadcast %99 : vector<1x1xf32> to vector<2x1xf32>
    %101 = arith.addf %98, %100 : vector<2x1xf32>
    %102 = math.tanh %101 : vector<2x1xf32>
    %cst_41 = arith.constant 2.000000e+01 : f32
    %103 = vector.broadcast %cst_41 : f32 to vector<2x1xf32>
    %104 = arith.mulf %102, %103 : vector<2x1xf32>
    %c0_42 = arith.constant 0 : index
    %c0_43 = arith.constant 0 : index
    %105 = vector.load %arg11[%c0_42, %c0_43] : memref<2x1xf32, #tpu.memory_space<vmem>>, vector<2x1xf32>
    tpu.vector_store %arg11[%c0_42, %c0_43], %104 {strides = array<i32>} : memref<2x1xf32, #tpu.memory_space<vmem>>, vector<2x1xf32>,
    return
  }
}

</mosaic_0001>

<bundles_post_ra>
// kernel: actor_forward.1
= control target key start
LH: loop header
LB: loop body
LE: loop exit
PB: predicated region body
PF: predicated region fallthrough
CT: control target
= control target key end

     0   :  { %s3658_s0 = inlined_call_operand.vmem [shape: f32[20,3], index: 0, kind: input, shape index: {}]   ;;  %s3659_s1 = inlined_call_operand.vmem [shape: f32[3,100], index: 1, kind: input, shape index: {}]   ;;  %s3660_s2 = inlined_call_operand.hbm [shape: f32[100,100], index: 2, kind: input, shape index: {}]   ;;  %s3661_s3 = inlined_call_operand.vmem [shape: f32[1,100], index: 3, kind: input, shape index: {}]   ;;  %s3662_s4 = inlined_call_operand.hbm [shape: f32[100,100], index: 4, kind: input, shape index: {}]   ;;  %s3663_s5 = inlined_call_operand.hbm [shape: f32[100,100], index: 5, kind: input, shape index: {}]   ;;  %s3664_s6 = inlined_call_operand.vmem [shape: f32[1,100], index: 6, kind: input, shape index: {}]   ;;  %s3665_s7 = inlined_call_operand.vmem [shape: f32[1,100], index: 7, kind: input, shape index: {}]   ;;  %s3666_s8 = inlined_call_operand.<no memory space> [shape: f32[1,1], index: 8, kind: input, shape index: {}]   ;;  %s3667_s9 = inlined_call_operand.vmem [shape: f32[1,100], index: 9, kind: input, shape index: {}]   ;;  %s3668_s11 = inlined_call_operand.vmem [shape: f32[2,1], index: 11, kind: output, shape index: {0}]   ;;  %s3669_s12 = inlined_call_operand.hbm [shape: f32[2,10], index: 12, kind: output, shape index: {1}]   ;;  %s3670_s10 = inlined_call_operand.<no memory space> [shape: f32[1,1], index: 10, kind: input, shape index: {}]  }
   0x1   :  { %v18_v0 = vstv %s3666_s8  ;;  %v20_v1 = vstv %s3670_s10 }
   0x2   :  { %19 = vst [vmem:[#allocation2] sm:$0x1] %v18_v0  ;;  %21 = vst [vmem:[#allocation3] sm:$0x1] %v20_v1 }
   0x3   :  { %22 = vsyncpa [#allocation5], 0 }
   0x4   :  { %23 = vsyncpa [#allocation8], 0 }
   0x5   :  { %24 = vsyncpa [#allocation6], 0  ;;  %s3068_s25 = smov [#allocation7]   ;;  %s3069_s27 = smov [#allocation4]  }
   0x6   :  { %s48_s26 = sshll.u32 %s3068_s25, 4  ;;  %s34_s28 = sshll.u32 %s3069_s27, 4  ;;  %s49_s26 = int_to_ptr.vmem [resolvable:$true] %s48_s26  ;;  %s3151_s28 = int_to_ptr.vmem [resolvable:$true] %s34_s28 }
   0x7   :  { %s2974_s8 = scalar_lea.hbm %s3662_s4, 1664 }
   0x8   :  { %p2975_p0 = scmp.ne.s32.totalorder %s3662_s4, %s2974_s8  ;;  %p2978_p1 = scmp.lt.u32.totalorder %s2974_s8, %s3662_s4 }
   0xa   :  { %p2980_p2 = pnand %p2978_p1, %p2975_p0 }
   0xc   :  { %2983 = shalt.err (!%p2980_p2)
}
   0xd   :  { %s2984_s16 = scalar_lea.vmem %s49_s26, 1664  ;;  %p2989_p4 = scmp.lt.s32.totalorder %s49_s26, %s49_s26 }
   0xe   :  { %p2985_p3 = scmp.ne.s32.totalorder %s49_s26, %s2984_s16  ;;  %p2990_p5 = scmp.lt.s32.totalorder %s2984_s16, %s2984_s16 }
  0x10   :  { %p2991_p6 = por %p2990_p5, %p2989_p4 }
  0x12   :  { %p2992_p7 = pnand %p2991_p6, %p2985_p3 }
  0x14   :  { %2995 = shalt.err (!%p2992_p7)
}
  0x15   :  { %s3070_s17 = smov 128   ;;  %s3071_s18 = smov 8  }
  0x16   :  { %54 = dma.hbm_to_vmem [thread:$0]  %s3662_s4, 1664, %s49_s26, [#allocation8], %s3070_s17, %s3070_s17, %s3071_s18  }
  0x17   :  { %s2996_s23 = scalar_lea.hbm %s3660_s2, 1664 }
  0x18   :  { %p2997_p8 = scmp.ne.s32.totalorder %s3660_s2, %s2996_s23  ;;  %p3000_p9 = scmp.lt.u32.totalorder %s2996_s23, %s3660_s2 }
  0x1a   :  { %p3002_p10 = pnand %p3000_p9, %p2997_p8 }
  0x1c   :  { %3005 = shalt.err (!%p3002_p10)
}
  0x1d   :  { %s3006_s30 = scalar_lea.vmem %s3151_s28, 1664  ;;  %p3011_p12 = scmp.lt.s32.totalorder %s3151_s28, %s3151_s28 }
  0x1e   :  { %p3007_p11 = scmp.ne.s32.totalorder %s3151_s28, %s3006_s30  ;;  %p3012_p13 = scmp.lt.s32.totalorder %s3006_s30, %s3006_s30 }
  0x20   :  { %p3013_p0 = por %p3012_p13, %p3011_p12 }
  0x22   :  { %p3014_p1 = pnand %p3013_p0, %p3007_p11 }
  0x24   :  { %3017 = shalt.err (!%p3014_p1)
}
  0x25   :  { %40 = dma.hbm_to_vmem [thread:$0]  %s3660_s2, 1664, %s3151_s28, [#allocation5], %s3070_s17, %s3070_s17, %s3071_s18  }
  0x26   :  { %s3072_s8 = smov [#allocation9]   ;;  %s3018_s15 = scalar_lea.hbm %s3663_s5, 1664 }
  0x27   :  { %s60_s13 = sshll.u32 %s3072_s8, 4  ;;  %p3019_p2 = scmp.ne.s32.totalorder %s3663_s5, %s3018_s15  ;;  %s61_s13 = int_to_ptr.vmem [resolvable:$true] %s60_s13 }
  0x28   :  { %p3022_p3 = scmp.lt.u32.totalorder %s3018_s15, %s3663_s5 }
  0x2a   :  { %p3024_p4 = pnand %p3022_p3, %p3019_p2 }
  0x2c   :  { %3027 = shalt.err (!%p3024_p4)
}
  0x2d   :  { %s3028_s22 = scalar_lea.vmem %s61_s13, 1664  ;;  %p3033_p6 = scmp.lt.s32.totalorder %s61_s13, %s61_s13 }
  0x2e   :  { %p3029_p5 = scmp.ne.s32.totalorder %s61_s13, %s3028_s22  ;;  %p3034_p7 = scmp.lt.s32.totalorder %s3028_s22, %s3028_s22 }
  0x30   :  { %p3035_p8 = por %p3034_p7, %p3033_p6 }
  0x32   :  { %p3036_p9 = pnand %p3035_p8, %p3029_p5 }
  0x34   :  { %3039 = shalt.err (!%p3036_p9)
}
  0x35   :  { %66 = dma.hbm_to_vmem [thread:$0]  %s3663_s5, 1664, %s61_s13, [#allocation8], %s3070_s17, %s3070_s17, %s3071_s18  }
  0x36   :  { %3062 = dma.done.wait [#allocation5], 1664  }
  0x37   :  { %3063 = vsyncadd [#allocation5], 4294965632 }
  0x38   :  { %3064 = dma.done.wait [#allocation8], 3328  }
  0x39   :  { %3065 = vsyncadd [#allocation8], 4294963968  ;;  %v3073_v2 = vmov 0.0   ;;  %vm3074_vm0 = vmmov 0   ;;  %v3075_v3 = vmov 0.0|0.0   ;;  %vm120_vm1 = vcmask 1042432  }
  0x3a   :  { %2325 = vmatprep.subr.mxu1 %v3073_v2  ;;  %2327 = vmatprep.mubr.msk.f32.mxu1 %vm3074_vm0, %v3073_v2  ;;  %vm110_vm2 = vcmask 23552   ;;  %v102_v4 = vld [vmem:[%s3659_s1] sm:$0x7]  ;;  %v87_v7 = vld [vmem:[#allocation4 + $0x8] sm:$0xff]  ;;  %v88_v8 = vld [vmem:[#allocation4 + $0x10] sm:$0xff]  ;;  %vm208_vm3 = vcmask 1043456   ;;  %v989_v47 = vlaneseq }
  0x3b   :  { %2708 = vmatprep.subr.bf16.mxu0 %v3075_v3  ;;  %2391 = vmatprep.mubr.msk.f32.mxu0 %vm3074_vm0, %v3073_v2  ;;  %v99_v5 = vld [vmem:[%s3658_s0] sm:$0xff]  ;;  %v100_v11 = vld [vmem:[%s3658_s0 + $0x8] sm:$0xff]  ;;  %v101_v15 = vld [vmem:[%s3658_s0 + $0x10] sm:$0xf]  ;;  %vm204_vm4 = vcmask 818176   ;;  %vm1305_vm5 = vcmask 1040384  }
  0x3c   :  { %v86_v6 = vld [vmem:[#allocation4] sm:$0xff]  ;;  %2326 = vmatpush3.msk.msra.mxu1 %vm120_vm1, %v102_v4  ;;  %v89_v9 = vld [vmem:[#allocation4 + $0x18] sm:$0xff]  ;;  %v91_v14 = vld [vmem:[#allocation4 + $0x28] sm:$0xff]  ;;  %v3076_v45 = vmov 1966171168   ;;  %v3324_v49 = vshrl.u32 %v989_v47, 7 }
  0x3d   :  { %2328 = vmatmul.mubr.msk.f32.vlgmr.msra.gmra.mrb[0].mxu1 %vm110_vm2, %v99_v5  ;;  %2690 = vmatprep.subr.bf16.mxu1 %v3075_v3  ;;  %v3218_v10 = vpack.c.bf16 %v87_v7, %v86_v6  ;;  %v3226_v12 = vpack.c.bf16 %v89_v9, %v88_v8  ;;  %v90_v13 = vld [vmem:[#allocation4 + $0x20] sm:$0xff]  ;;  %v92_v17 = vld [vmem:[#allocation4 + $0x30] sm:$0xff]  ;;  %v93_v18 = vld [vmem:[#allocation4 + $0x38] sm:$0xff]  ;;  %v987_v46 = vunpack.c.l.s4 %v3076_v45  ;;  %vm1308_vm6 = vcmask 1041408   ;;  %s3079_s8 = smov [#allocation10]  }
  0x3e   :  { %2330 = vmatprep.mubr.msk.f32.mxu1 %vm3074_vm0, %v3073_v2  ;;  %v3238_v16 = vpack.c.bf16 %v91_v14, %v90_v13  ;;  %v3247_v19 = vpack.c.bf16 %v93_v18, %v92_v17  ;;  %v94_v20 = vld [vmem:[#allocation4 + $0x40] sm:$0xff]  ;;  %v95_v21 = vld [vmem:[#allocation4 + $0x48] sm:$0xff]  ;;  %v96_v23 = vld [vmem:[#allocation4 + $0x50] sm:$0xff]  ;;  %v3333_v57 = vsub.s32 0, %v3324_v49  ;;  %vm1315_vm7 = vcmask 1044480   ;;  %s2104_s13 = sshll.u32 %s3079_s8, 4  ;;  %s2105_s13 = int_to_ptr.vmem [resolvable:$true] %s2104_s13 }
  0x3f   :  { %2692 = vmatpush3.bf16.msra.mxu1 %v3218_v10  ;;  %2710 = vmatpush3.bf16.msra.mxu0 %v3218_v10  ;;  %v3253_v22 = vpack.c.bf16 %v95_v21, %v94_v20  ;;  %v97_v24 = vld [vmem:[#allocation4 + $0x58] sm:$0xff]  ;;  %v3267_v26 = vld [vmem:[#allocation4 + $0x60] sm:$0xf]  ;;  %v988_v48 = vunpack.c.0.s8 %v987_v46  ;;  %vm1318_vm8 = vcmask 1045504   ;;  %vm1321_vm9 = vcmask 1046528   ;;  %s3040_s14 = scalar_lea.vmem %s2105_s13, 32  ;;  %p3045_p11 = scmp.lt.s32.totalorder %s2105_s13, %s2105_s13 }
  0x40   :  { %2693 = vmatprep.subr.bf16.mxu1 %v3075_v3  ;;  %2711 = vmatprep.subr.bf16.mxu0 %v3075_v3  ;;  %v3259_v25 = vpack.c.bf16 %v97_v24, %v96_v23  ;;  %v2116_v29 = vld [vmem:[%s3661_s3] ss:$0 sm:$0xff]  ;;  %vm1868_vm10 = vcmask 812032   ;;  %vm1907_vm11 = vcmask 130112   ;;  %vm1918_vm12 = vcmask 1041409   ;;  %p3041_p10 = scmp.ne.s32.totalorder %s2105_s13, %s3040_s14  ;;  %p3046_p12 = scmp.lt.s32.totalorder %s3040_s14, %s3040_s14 }
  0x41   :  { %2331 = vmatmul.mubr.msk.f32.gmra.mrb[2].mxu1 %vm110_vm2, %v100_v11  ;;  %v3327_v50 = vsub.s32 %v988_v48, %v3324_v49  ;;  %vm1921_vm13 = vcmask 74752  }
  0x42   :  { %2333 = vmatprep.mubr.msk.f32.mxu1 %vm3074_vm0, %v3073_v2  ;;  %p3047_p13 = por %p3046_p12, %p3045_p11 }
  0x43   :  { %2695 = vmatpush3.bf16.msra.mxu1 %v3226_v12  ;;  %2713 = vmatpush3.bf16.msra.mxu0 %v3226_v12 }
  0x44   :  { %2696 = vmatprep.subr.bf16.mxu1 %v3075_v3  ;;  %2714 = vmatprep.subr.bf16.mxu0 %v3075_v3  ;;  %p3048_p0 = pnand %p3047_p13, %p3041_p10 }
  0x45   :  { %2334 = vmatmul.mubr.msk.f32.gmra.mrb[4].mxu1 %vm110_vm2, %v101_v15 }
  0x46   :  { %2362 = vmatprep.mubr.msk.f32.mxu1 %vm3074_vm0, %v3073_v2 }
  0x47   :  { %2698 = vmatpush3.bf16.msra.mxu1 %v3238_v16  ;;  %2716 = vmatpush3.bf16.msra.mxu0 %v3238_v16 }
  0x48   :  { %2699 = vmatprep.subr.bf16.mxu1 %v3075_v3  ;;  %2717 = vmatprep.subr.bf16.mxu0 %v3075_v3 }
  0x4b   :  { %2701 = vmatpush3.bf16.msra.mxu1 %v3247_v19  ;;  %2719 = vmatpush3.bf16.msra.mxu0 %v3247_v19 }
  0x4c   :  { %2702 = vmatprep.subr.bf16.mxu1 %v3075_v3  ;;  %2720 = vmatprep.subr.bf16.mxu0 %v3075_v3 }
  0x4f   :  { %2704 = vmatpush3.bf16.msra.mxu1 %v3253_v22  ;;  %2722 = vmatpush3.bf16.msra.mxu0 %v3253_v22 }
  0x50   :  { %2705 = vmatprep.subr.bf16.mxu1 %v3075_v3  ;;  %2723 = vmatprep.subr.bf16.mxu0 %v3075_v3 }
  0x53   :  { %2707 = vmatpush3.bf16.msra.mxu1 %v3259_v25  ;;  %2725 = vmatpush3.bf16.msra.mxu0 %v3259_v25 }
  0x54   :  { %2360 = vmatprep.subr.mxu1 %v3073_v2  ;;  %2389 = vmatprep.subr.mxu0 %v3073_v2 }
  0x57   :  { %2361 = vmatpush3.msk.msra.mxu1 %vm208_vm3, %v3267_v26  ;;  %2390 = vmatpush3.msk.msra.mxu0 %vm208_vm3, %v3267_v26 }
  0x58   :  { %2363 = vmatmul.mubr.f32.vlgmr.msra.gmra.mrb[6].mxu1 %v3073_v2  ;;  %2726 = vmatprep.subr.bf16.mxu1 %v3075_v3 }
  0x59   :  { %2728 = vmatpush3.bf16.msra.mxu1 %v3218_v10  ;;  %2420 = vmatprep.mubr.msk.f32.mxu1 %vm3074_vm0, %v3073_v2 }
  0x5a   :  { %2729 = vmatprep.subr.bf16.mxu1 %v3075_v3  ;;  %2744 = vmatprep.subr.bf16.mxu0 %v3075_v3 }
  0x5d   :  { %2731 = vmatpush3.bf16.msra.mxu1 %v3226_v12 }
  0x5e   :  { %2732 = vmatprep.subr.bf16.mxu1 %v3075_v3 }
  0x61   :  { %2734 = vmatpush3.bf16.msra.mxu1 %v3238_v16 }
  0x62   :  { %2735 = vmatprep.subr.bf16.mxu1 %v3075_v3 }
  0x65   :  { %2737 = vmatpush3.bf16.msra.mxu1 %v3247_v19 }
  0x66   :  { %2738 = vmatprep.subr.bf16.mxu1 %v3075_v3 }
  0x69   :  { %2740 = vmatpush3.bf16.msra.mxu1 %v3253_v22 }
  0x6a   :  { %2741 = vmatprep.subr.bf16.mxu1 %v3075_v3 }
  0x6d   :  { %2743 = vmatpush3.bf16.msra.mxu1 %v3259_v25 }
  0x6e   :  { %2418 = vmatprep.subr.mxu1 %v3073_v2 }
  0x71   :  { %2419 = vmatpush3.msk.msra.mxu1 %vm208_vm3, %v3267_v26 }
  0x72   :  { %2762 = vmatprep.subr.bf16.mxu1 %v3075_v3 }
 0x110   :  { %v190_v27 = vpop.f32.mrb[0].mxu1 }
 0x111   :  { %v2329_v28 = vpop.f32.mrb[1].mxu1  ;;  %v3301_v36 = vadd.f32 %v2116_v29, %v190_v27 }
 0x114   :  { %v195_v30 = vpop.f32.mrb[2].mxu1 }
 0x115   :  { %v3297_v31 = vadd.f32 %v2116_v29, %v195_v30  ;;  %v2332_v32 = vpop.f32.mrb[3].mxu1 }
 0x118   :  { %v200_v33 = vpop.f32.mrb[4].mxu1 }
 0x119   :  { %v3299_v34 = vadd.f32 %v2116_v29, %v200_v33  ;;  %v2335_v35 = vpop.f32.mrb[5].mxu1 }
 0x12b   :  { %v278_v37 = vpop.f32.mrb[6].mxu1 }
 0x12c   :  { %v282_v38 = vadd.f32 %v278_v37, %v3301_v36  ;;  %v2364_v39 = vpop.f32.mrb[7].mxu1 }
 0x12e   :  { %2920 = vtanh.f32 %v282_v38 }
 0x138   :  { %v2921_v40 = vpop.eup %2920 }
 0x139   :  { %2392 = vmatmul.mubr.msk.f32.vlgmr.msra.gmra.mrb[0].mxu0 %vm204_vm4, %v2921_v40  ;;  %v992_v52 = vrot.slane %v2921_v40, %v3327_v50 }
 0x13a   :  { %2746 = vmatpush3.bf16.msra.mxu0 %v3218_v10  ;;  %2449 = vmatprep.mubr.msk.f32.mxu0 %vm3074_vm0, %v3073_v2 }
 0x13b   :  { %2747 = vmatprep.subr.bf16.mxu0 %v3075_v3  ;;  %v993_v58 = vcombine.high %v992_v52, %v992_v52  ;;  %v1000_v61 = vrot.slane %v992_v52, %v3327_v50 }
 0x13d   :  { %v1007_v0 = vrot.slane %v993_v58, %v3327_v50 }
 0x13e   :  { %2749 = vmatpush3.bf16.msra.mxu0 %v3226_v12 }
 0x13f   :  { %2750 = vmatprep.subr.bf16.mxu0 %v3075_v3 }
 0x142   :  { %2752 = vmatpush3.bf16.msra.mxu0 %v3238_v16 }
 0x143   :  { %2753 = vmatprep.subr.bf16.mxu0 %v3075_v3 }
 0x146   :  { %2755 = vmatpush3.bf16.msra.mxu0 %v3247_v19 }
 0x147   :  { %2756 = vmatprep.subr.bf16.mxu0 %v3075_v3 }
 0x14a   :  { %2758 = vmatpush3.bf16.msra.mxu0 %v3253_v22 }
 0x14b   :  { %2759 = vmatprep.subr.bf16.mxu0 %v3075_v3 }
 0x14e   :  { %2761 = vmatpush3.bf16.msra.mxu0 %v3259_v25 }
 0x14f   :  { %2447 = vmatprep.subr.mxu0 %v3073_v2 }
 0x152   :  { %2448 = vmatpush3.msk.msra.mxu0 %vm208_vm3, %v3267_v26 }
 0x153   :  { %2780 = vmatprep.subr.bf16.mxu0 %v3075_v3 }
 0x20c   :  { %v353_v41 = vpop.f32.mrb[0].mxu0 }
 0x20d   :  { %v358_v42 = vrot.slane %v353_v41, 6  ;;  %v2393_v43 = vpop.f32.mrb[1].mxu0 }
 0x20f   :  { %v360_v44 = vadd.f32 %v358_v42, %v3301_v36 }
 0x211   :  { %2922 = vtanh.f32 %v360_v44 }
 0x21b   :  { %v2923_v51 = vpop.eup %2922 }
 0x21c   :  { %v1016_v53 = vrot.slane %v2923_v51, %v3327_v50  ;;  %v363_v54 = vrot.slane %v2923_v51, 2 }
 0x21e   :  { %v1017_v55 = vcombine.high %v1016_v53, %v1016_v53  ;;  %v1024_v56 = vrot.slane %v1016_v53, %v3327_v50  ;;  %2421 = vmatmul.mubr.msk.f32.vlgmr.msra.gmra.mrb[8].mxu1 %vm204_vm4, %v363_v54 }
 0x21f   :  { %2764 = vmatpush3.bf16.msra.mxu1 %v3218_v10  ;;  %2478 = vmatprep.mubr.msk.f32.mxu1 %vm3074_vm0, %v3073_v2 }
 0x220   :  { %v1031_v59 = vrot.slane %v1017_v55, %v3327_v50  ;;  %v1032_v60 = vcombine.high %v1024_v56, %v1024_v56  ;;  %2765 = vmatprep.subr.bf16.mxu1 %v3075_v3 }
 0x222   :  { %v1033_v62 = vcombine.high %v1031_v59, %v1031_v59  ;;  %v1228_v63 = vrot.slane %v1032_v60, %v3333_v57 }
 0x223   :  { %2767 = vmatpush3.bf16.msra.mxu1 %v3226_v12 }
 0x224   :  { %v1232_v1 = vrot.slane %v1033_v62, %v3333_v57  ;;  %v1306_v4 = vsel %vm1305_vm5, %v1000_v61, %v1228_v63  ;;  %2768 = vmatprep.subr.bf16.mxu1 %v3075_v3 }
 0x226   :  { %v1307_v5 = vsel %vm1305_vm5, %v1007_v0, %v1232_v1 }
 0x227   :  { %2770 = vmatpush3.bf16.msra.mxu1 %v3238_v16 }
 0x228   :  { %2771 = vmatprep.subr.bf16.mxu1 %v3075_v3 }
 0x22b   :  { %2773 = vmatpush3.bf16.msra.mxu1 %v3247_v19 }
 0x22c   :  { %2774 = vmatprep.subr.bf16.mxu1 %v3075_v3 }
 0x22f   :  { %2776 = vmatpush3.bf16.msra.mxu1 %v3253_v22 }
 0x230   :  { %2777 = vmatprep.subr.bf16.mxu1 %v3075_v3 }
 0x233   :  { %2779 = vmatpush3.bf16.msra.mxu1 %v3259_v25 }
 0x234   :  { %2476 = vmatprep.subr.mxu1 %v3073_v2 }
 0x237   :  { %2477 = vmatpush3.msk.msra.mxu1 %vm208_vm3, %v3267_v26 }
 0x238   :  { %2798 = vmatprep.subr.bf16.mxu1 %v3075_v3 }
 0x2f1   :  { %v432_v6 = vpop.f32.mrb[8].mxu1 }
 0x2f2   :  { %v437_v7 = vrot.slane %v432_v6, 4  ;;  %v2422_v8 = vpop.f32.mrb[9].mxu1 }
 0x2f4   :  { %v439_v9 = vadd.f32 %v437_v7, %v3301_v36 }
 0x2f6   :  { %2924 = vtanh.f32 %v439_v9 }
 0x300   :  { %v2925_v11 = vpop.eup %2924 }
 0x301   :  { %v1034_v13 = vcombine.high %v2925_v11, %v2925_v11  ;;  %v442_v14 = vrot.slane %v2925_v11, 4 }
 0x303   :  { %v1041_v15 = vrot.slane %v1034_v13, %v3327_v50  ;;  %2450 = vmatmul.mubr.msk.f32.vlgmr.msra.gmra.mrb[2].mxu0 %vm204_vm4, %v442_v14 }
 0x304   :  { %2782 = vmatpush3.bf16.msra.mxu0 %v3218_v10  ;;  %2507 = vmatprep.mubr.msk.f32.mxu0 %vm3074_vm0, %v3073_v2 }
 0x305   :  { %v1042_v17 = vcombine.high %v1041_v15, %v1041_v15  ;;  %v1049_v18 = vrot.slane %v1041_v15, %v3327_v50  ;;  %2783 = vmatprep.subr.bf16.mxu0 %v3075_v3 }
 0x307   :  { %v1056_v20 = vrot.slane %v1042_v17, %v3327_v50  ;;  %v1238_v21 = vrot.slane %v1049_v18, %v3333_v57 }
 0x308   :  { %2785 = vmatpush3.bf16.msra.mxu0 %v3226_v12 }
 0x309   :  { %v1242_v23 = vrot.slane %v1056_v20, %v3333_v57  ;;  %v1309_v24 = vsel %vm1308_vm6, %v1306_v4, %v1238_v21  ;;  %2786 = vmatprep.subr.bf16.mxu0 %v3075_v3 }
 0x30b   :  { %v1310_v27 = vsel %vm1308_vm6, %v1307_v5, %v1242_v23 }
 0x30c   :  { %2788 = vmatpush3.bf16.msra.mxu0 %v3238_v16 }
 0x30d   :  { %2789 = vmatprep.subr.bf16.mxu0 %v3075_v3 }
 0x310   :  { %2791 = vmatpush3.bf16.msra.mxu0 %v3247_v19 }
 0x311   :  { %2792 = vmatprep.subr.bf16.mxu0 %v3075_v3 }
 0x314   :  { %2794 = vmatpush3.bf16.msra.mxu0 %v3253_v22 }
 0x315   :  { %2795 = vmatprep.subr.bf16.mxu0 %v3075_v3 }
 0x318   :  { %2797 = vmatpush3.bf16.msra.mxu0 %v3259_v25 }
 0x319   :  { %2505 = vmatprep.subr.mxu0 %v3073_v2 }
 0x31c   :  { %2506 = vmatpush3.msk.msra.mxu0 %vm208_vm3, %v3267_v26 }
 0x31d   :  { %2816 = vmatprep.subr.bf16.mxu0 %v3075_v3 }
 0x3d6   :  { %v511_v28 = vpop.f32.mrb[2].mxu0 }
 0x3d7   :  { %v516_v29 = vrot.slane %v511_v28, 2  ;;  %v2451_v30 = vpop.f32.mrb[3].mxu0 }
 0x3d9   :  { %v518_v32 = vadd.f32 %v516_v29, %v3301_v36 }
 0x3db   :  { %2926 = vtanh.f32 %v518_v32 }
 0x3e5   :  { %v2927_v33 = vpop.eup %2926 }
 0x3e6   :  { %v1057_v35 = vcombine.high %v2927_v33, %v2927_v33  ;;  %v521_v37 = vrot.slane %v2927_v33, 6 }
 0x3e8   :  { %v1064_v38 = vrot.slane %v1057_v35, %v3327_v50  ;;  %2479 = vmatmul.mubr.msk.f32.vlgmr.msra.gmra.mrb[10].mxu1 %vm204_vm4, %v521_v37 }
 0x3e9   :  { %2800 = vmatpush3.bf16.msra.mxu1 %v3218_v10  ;;  %2536 = vmatprep.mubr.msk.f32.mxu1 %vm3074_vm0, %v3073_v2 }
 0x3ea   :  { %v1065_v39 = vcombine.high %v1064_v38, %v1064_v38  ;;  %v1072_v40 = vrot.slane %v1064_v38, %v3327_v50  ;;  %2801 = vmatprep.subr.bf16.mxu1 %v3075_v3 }
 0x3ec   :  { %v1079_v36 = vrot.slane %v1065_v39, %v3327_v50  ;;  %v1080_v41 = vcombine.high %v1072_v40, %v1072_v40 }
 0x3ed   :  { %2803 = vmatpush3.bf16.msra.mxu1 %v3226_v12 }
 0x3ee   :  { %v1081_v42 = vcombine.high %v1079_v36, %v1079_v36  ;;  %v1248_v43 = vrot.slane %v1080_v41, %v3333_v57  ;;  %2804 = vmatprep.subr.bf16.mxu1 %v3075_v3 }
 0x3f0   :  { %v1252_v44 = vrot.slane %v1081_v42, %v3333_v57  ;;  %v1311_v45 = vsel %vm120_vm1, %v1309_v24, %v1248_v43 }
 0x3f1   :  { %2806 = vmatpush3.bf16.msra.mxu1 %v3238_v16 }
 0x3f2   :  { %2807 = vmatprep.subr.bf16.mxu1 %v3075_v3  ;;  %v1312_v46 = vsel %vm120_vm1, %v1310_v27, %v1252_v44 }
 0x3f5   :  { %2809 = vmatpush3.bf16.msra.mxu1 %v3247_v19 }
 0x3f6   :  { %2810 = vmatprep.subr.bf16.mxu1 %v3075_v3 }
 0x3f9   :  { %2812 = vmatpush3.bf16.msra.mxu1 %v3253_v22 }
 0x3fa   :  { %2813 = vmatprep.subr.bf16.mxu1 %v3075_v3 }
 0x3fd   :  { %2815 = vmatpush3.bf16.msra.mxu1 %v3259_v25 }
 0x3fe   :  { %2534 = vmatprep.subr.mxu1 %v3073_v2 }
 0x401   :  { %2535 = vmatpush3.msk.msra.mxu1 %vm208_vm3, %v3267_v26 }
 0x402   :  { %2834 = vmatprep.subr.bf16.mxu1 %v3075_v3 }
 0x4bb   :  { %v590_v48 = vpop.f32.mrb[10].mxu1 }
 0x4bc   :  { %v594_v51 = vadd.f32 %v590_v48, %v3297_v31  ;;  %v2480_v52 = vpop.f32.mrb[11].mxu1 }
 0x4be   :  { %2928 = vtanh.f32 %v594_v51 }
 0x4c8   :  { %v2929_v53 = vpop.eup %2928 }
 0x4c9   :  { %v1088_v54 = vrot.slane %v2929_v53, %v3327_v50  ;;  %2508 = vmatmul.mubr.msk.f32.vlgmr.msra.gmra.mrb[4].mxu0 %vm204_vm4, %v2929_v53  ;;  %v1378_v53 = vld [vmem:[#allocation7] sm:$0xff] }
 0x4ca   :  { %2818 = vmatpush3.bf16.msra.mxu0 %v3218_v10  ;;  %2565 = vmatprep.mubr.msk.f32.mxu0 %vm3074_vm0, %v3073_v2 }
 0x4cb   :  { %v1089_v55 = vcombine.high %v1088_v54, %v1088_v54  ;;  %v1096_v56 = vrot.slane %v1088_v54, %v3327_v50  ;;  %2819 = vmatprep.subr.bf16.mxu0 %v3075_v3  ;;  %v1379_v54 = vld [vmem:[#allocation7 + $0x8] sm:$0xff] }
 0x4cd   :  { %v1103_v58 = vrot.slane %v1089_v55, %v3327_v50  ;;  %v1258_v59 = vrot.slane %v1096_v56, %v3333_v57  ;;  %v1380_v55 = vld [vmem:[#allocation7 + $0x10] sm:$0xff]  ;;  %v2871_v56 = vpack.c.bf16 %v1379_v54, %v1378_v53  ;;  %v1390_v53 = vld [vmem:[#allocation7 + $0x60] sm:$0xf] }
 0x4ce   :  { %2821 = vmatpush3.bf16.msra.mxu0 %v3226_v12 }
 0x4cf   :  { %v1262_v60 = vrot.slane %v1103_v58, %v3333_v57  ;;  %v1313_v61 = vsel %vm208_vm3, %v1311_v45, %v1258_v59  ;;  %2822 = vmatprep.subr.bf16.mxu0 %v3075_v3  ;;  %v1381_v58 = vld [vmem:[#allocation7 + $0x18] sm:$0xff] }
 0x4d0   :  { %v2874_v59 = vpack.c.bf16 %v1381_v58, %v1380_v55 }
 0x4d1   :  { %v1314_v62 = vsel %vm208_vm3, %v1312_v46, %v1262_v60 }
 0x4d2   :  { %2824 = vmatpush3.bf16.msra.mxu0 %v3238_v16 }
 0x4d3   :  { %2825 = vmatprep.subr.bf16.mxu0 %v3075_v3 }
 0x4d6   :  { %2827 = vmatpush3.bf16.msra.mxu0 %v3247_v19 }
 0x4d7   :  { %2828 = vmatprep.subr.bf16.mxu0 %v3075_v3 }
 0x4da   :  { %2830 = vmatpush3.bf16.msra.mxu0 %v3253_v22 }
 0x4db   :  { %2831 = vmatprep.subr.bf16.mxu0 %v3075_v3 }
 0x4de   :  { %2833 = vmatpush3.bf16.msra.mxu0 %v3259_v25 }
 0x4df   :  { %2563 = vmatprep.subr.mxu0 %v3073_v2 }
 0x4e2   :  { %2564 = vmatpush3.msk.msra.mxu0 %vm208_vm3, %v3267_v26 }
 0x4e3   :  { %2852 = vmatprep.subr.bf16.mxu0 %v3075_v3 }
 0x59c   :  { %v665_v63 = vpop.f32.mrb[4].mxu0 }
 0x59d   :  { %v670_v0 = vrot.slane %v665_v63, 6  ;;  %v2509_v1 = vpop.f32.mrb[5].mxu0  ;;  %v1474_v63 = vld [vmem:[#allocation9] sm:$0xff] }
 0x59f   :  { %v672_v4 = vadd.f32 %v670_v0, %v3297_v31  ;;  %v1475_v0 = vld [vmem:[#allocation9 + $0x8] sm:$0xff] }
 0x5a0   :  { %v2889_v1 = vpack.c.bf16 %v1475_v0, %v1474_v63 }
 0x5a1   :  { %2930 = vtanh.f32 %v672_v4  ;;  %v3077_v4 = vmov 1983009808  }
 0x5ab   :  { %v2931_v5 = vpop.eup %2930 }
 0x5ac   :  { %v1110_v6 = vrot.slane %v2931_v5, %v3327_v50  ;;  %v675_v7 = vrot.slane %v2931_v5, 2  ;;  %v1332_v5 = vunpack.c.l.s4 %v3077_v4 }
 0x5ae   :  { %v1111_v8 = vcombine.high %v1110_v6, %v1110_v6  ;;  %v1118_v9 = vrot.slane %v1110_v6, %v3327_v50  ;;  %2537 = vmatmul.mubr.msk.f32.vlgmr.msra.gmra.mrb[12].mxu1 %vm204_vm4, %v675_v7  ;;  %v1476_v6 = vld [vmem:[#allocation9 + $0x10] sm:$0xff]  ;;  %v1477_v7 = vld [vmem:[#allocation9 + $0x18] sm:$0xff] }
 0x5af   :  { %2836 = vmatpush3.bf16.msra.mxu1 %v3218_v10  ;;  %2594 = vmatprep.mubr.msk.f32.mxu1 %vm3074_vm0, %v3073_v2 }
 0x5b0   :  { %v1125_v11 = vrot.slane %v1111_v8, %v3327_v50  ;;  %v1126_v13 = vcombine.high %v1118_v9, %v1118_v9  ;;  %2837 = vmatprep.subr.bf16.mxu1 %v3075_v3  ;;  %v2892_v9 = vpack.c.bf16 %v1477_v7, %v1476_v6 }
 0x5b2   :  { %v1127_v14 = vcombine.high %v1125_v11, %v1125_v11  ;;  %v1268_v15 = vrot.slane %v1126_v13, %v3333_v57  ;;  %v1333_v11 = vunpack.c.0.s8 %v1332_v5  ;;  %v1478_v13 = vld [vmem:[#allocation9 + $0x20] sm:$0xff] }
 0x5b3   :  { %2839 = vmatpush3.bf16.msra.mxu1 %v3226_v12 }
 0x5b4   :  { %v1272_v17 = vrot.slane %v1127_v14, %v3333_v57  ;;  %v1316_v18 = vsel %vm1315_vm7, %v1313_v61, %v1268_v15  ;;  %2840 = vmatprep.subr.bf16.mxu1 %v3075_v3  ;;  %v1479_v14 = vld [vmem:[#allocation9 + $0x28] sm:$0xff] }
 0x5b6   :  { %v1317_v20 = vsel %vm1315_vm7, %v1314_v62, %v1272_v17  ;;  %v2895_v17 = vpack.c.bf16 %v1479_v14, %v1478_v13 }
 0x5b7   :  { %2842 = vmatpush3.bf16.msra.mxu1 %v3238_v16 }
 0x5b8   :  { %2843 = vmatprep.subr.bf16.mxu1 %v3075_v3 }
 0x5bb   :  { %2845 = vmatpush3.bf16.msra.mxu1 %v3247_v19 }
 0x5bc   :  { %2846 = vmatprep.subr.bf16.mxu1 %v3075_v3 }
 0x5bf   :  { %2848 = vmatpush3.bf16.msra.mxu1 %v3253_v22 }
 0x5c0   :  { %2849 = vmatprep.subr.bf16.mxu1 %v3075_v3 }
 0x5c3   :  { %2851 = vmatpush3.bf16.msra.mxu1 %v3259_v25 }
 0x5c4   :  { %2592 = vmatprep.subr.mxu1 %v3073_v2 }
 0x5c7   :  { %2593 = vmatpush3.msk.msra.mxu1 %vm208_vm3, %v3267_v26 }
 0x5c8   :  { %2870 = vmatprep.subr.bf16.mxu1 %v3075_v3 }
 0x681   :  { %v744_v21 = vpop.f32.mrb[12].mxu1 }
 0x682   :  { %v749_v23 = vrot.slane %v744_v21, 4  ;;  %v2538_v24 = vpop.f32.mrb[13].mxu1  ;;  %v1481_v21 = vld [vmem:[#allocation9 + $0x38] sm:$0xff] }
 0x684   :  { %v751_v27 = vadd.f32 %v749_v23, %v3297_v31 }
 0x686   :  { %2932 = vtanh.f32 %v751_v27  ;;  %v1482_v27 = vld [vmem:[#allocation9 + $0x40] sm:$0xff] }
 0x690   :  { %v2933_v28 = vpop.eup %2932 }
 0x691   :  { %v1128_v29 = vcombine.high %v2933_v28, %v2933_v28  ;;  %v754_v30 = vrot.slane %v2933_v28, 4  ;;  %v1483_v28 = vld [vmem:[#allocation9 + $0x48] sm:$0xff] }
 0x693   :  { %v1135_v32 = vrot.slane %v1128_v29, %v3327_v50  ;;  %2566 = vmatmul.mubr.msk.f32.vlgmr.msra.gmra.mrb[6].mxu0 %vm204_vm4, %v754_v30 }
 0x694   :  { %2854 = vmatpush3.bf16.msra.mxu0 %v3218_v10  ;;  %2623 = vmatprep.mubr.msk.f32.mxu0 %vm3074_vm0, %v3073_v2 }
 0x695   :  { %v1136_v33 = vcombine.high %v1135_v32, %v1135_v32  ;;  %v1143_v35 = vrot.slane %v1135_v32, %v3327_v50  ;;  %2855 = vmatprep.subr.bf16.mxu0 %v3075_v3  ;;  %v2901_v32 = vpack.c.bf16 %v1483_v28, %v1482_v27 }
 0x697   :  { %v1150_v37 = vrot.slane %v1136_v33, %v3327_v50  ;;  %v1278_v38 = vrot.slane %v1143_v35, %v3333_v57  ;;  %v1484_v33 = vld [vmem:[#allocation9 + $0x50] sm:$0xff]  ;;  %v1485_v35 = vld [vmem:[#allocation9 + $0x58] sm:$0xff] }
 0x698   :  { %2857 = vmatpush3.bf16.msra.mxu0 %v3226_v12 }
 0x699   :  { %v1282_v39 = vrot.slane %v1150_v37, %v3333_v57  ;;  %2858 = vmatprep.subr.bf16.mxu0 %v3075_v3  ;;  %v1319_v10 = vsel %vm1318_vm8, %v1316_v18, %v1278_v38  ;;  %v3510_v18 = vsub.s32 %v1333_v11, %v3324_v49 }
 0x69b   :  { %v1320_v40 = vsel %vm1318_vm8, %v1317_v20, %v1282_v39  ;;  %v1480_v20 = vld [vmem:[#allocation9 + $0x30] sm:$0xff]  ;;  %v2904_v39 = vpack.c.bf16 %v1485_v35, %v1484_v33 }
 0x69c   :  { %2860 = vmatpush3.bf16.msra.mxu0 %v3238_v16  ;;  %v2898_v24 = vpack.c.bf16 %v1481_v21, %v1480_v20 }
 0x69d   :  { %2861 = vmatprep.subr.bf16.mxu0 %v3075_v3 }
 0x6a0   :  { %2863 = vmatpush3.bf16.msra.mxu0 %v3247_v19 }
 0x6a1   :  { %2864 = vmatprep.subr.bf16.mxu0 %v3075_v3 }
 0x6a4   :  { %2866 = vmatpush3.bf16.msra.mxu0 %v3253_v22 }
 0x6a5   :  { %2867 = vmatprep.subr.bf16.mxu0 %v3075_v3 }
 0x6a8   :  { %2869 = vmatpush3.bf16.msra.mxu0 %v3259_v25 }
 0x6a9   :  { %2621 = vmatprep.subr.mxu0 %v3073_v2 }
 0x6ac   :  { %2622 = vmatpush3.msk.msra.mxu0 %vm208_vm3, %v3267_v26 }
 0x6ad   :  { %2888 = vmatprep.subr.bf16.mxu0 %v3075_v3 }
 0x766   :  { %v823_v12 = vpop.f32.mrb[6].mxu0 }
 0x767   :  { %v828_v16 = vrot.slane %v823_v12, 2  ;;  %v2567_v36 = vpop.f32.mrb[7].mxu0  ;;  %v1486_v12 = vld [vmem:[#allocation9 + $0x60] sm:$0xf] }
 0x769   :  { %v830_v19 = vadd.f32 %v828_v16, %v3297_v31 }
 0x76b   :  { %2934 = vtanh.f32 %v830_v19  ;;  %v1382_v19 = vld [vmem:[#allocation7 + $0x20] sm:$0xff] }
 0x775   :  { %v2935_v41 = vpop.eup %2934 }
 0x776   :  { %v1151_v42 = vcombine.high %v2935_v41, %v2935_v41  ;;  %v833_v22 = vrot.slane %v2935_v41, 6  ;;  %v1383_v41 = vld [vmem:[#allocation7 + $0x28] sm:$0xff] }
 0x778   :  { %v1158_v43 = vrot.slane %v1151_v42, %v3327_v50  ;;  %2595 = vmatmul.mubr.msk.f32.vlgmr.msra.gmra.mrb[14].mxu1 %vm204_vm4, %v833_v22  ;;  %v2877_v42 = vpack.c.bf16 %v1383_v41, %v1382_v19  ;;  %v1384_v22 = vld [vmem:[#allocation7 + $0x30] sm:$0xff] }
 0x779   :  { %2652 = vmatprep.mubr.msk.f32.mxu1 %vm3074_vm0, %v3073_v2  ;;  %2872 = vmatpush3.bf16.msra.mxu1 %v2871_v56 }
 0x77a   :  { %v1159_v25 = vcombine.high %v1158_v43, %v1158_v43  ;;  %v1166_v26 = vrot.slane %v1158_v43, %v3327_v50  ;;  %2873 = vmatprep.subr.bf16.mxu1 %v3075_v3  ;;  %v1385_v43 = vld [vmem:[#allocation7 + $0x38] sm:$0xff] }
 0x77c   :  { %v1173_v44 = vrot.slane %v1159_v25, %v3327_v50  ;;  %v1174_v45 = vcombine.high %v1166_v26, %v1166_v26  ;;  %v2880_v25 = vpack.c.bf16 %v1385_v43, %v1384_v22  ;;  %v1386_v26 = vld [vmem:[#allocation7 + $0x40] sm:$0xff] }
 0x77d   :  { %2875 = vmatpush3.bf16.msra.mxu1 %v2874_v59 }
 0x77e   :  { %v1175_v46 = vcombine.high %v1173_v44, %v1173_v44  ;;  %v1288_v31 = vrot.slane %v1174_v45, %v3333_v57  ;;  %2876 = vmatprep.subr.bf16.mxu1 %v3075_v3  ;;  %v1387_v44 = vld [vmem:[#allocation7 + $0x48] sm:$0xff] }
 0x77f   :  { %v2883_v45 = vpack.c.bf16 %v1387_v44, %v1386_v26 }
 0x780   :  { %v3492_v48 = vsel %vm1321_vm9, %v1319_v10, %v1288_v31  ;;  %v1292_v51 = vrot.slane %v1175_v46, %v3333_v57  ;;  %v1388_v46 = vld [vmem:[#allocation7 + $0x50] sm:$0xff]  ;;  %v1389_v31 = vld [vmem:[#allocation7 + $0x58] sm:$0xff] }
 0x781   :  { %v1330_v15 = vcombine.high %v3492_v48, %v3492_v48  ;;  %v1337_v29 = vrot.slane %v3492_v48, %v3510_v18  ;;  %2878 = vmatpush3.bf16.msra.mxu1 %v2877_v42 }
 0x782   :  { %v3495_v52 = vsel %vm1321_vm9, %v1320_v40, %v1292_v51  ;;  %2879 = vmatprep.subr.bf16.mxu1 %v3075_v3  ;;  %v2886_v51 = vpack.c.bf16 %v1389_v31, %v1388_v46 }
 0x783   :  { %v1344_v23 = vrot.slane %v1330_v15, %v3510_v18  ;;  %v1345_v37 = vcombine.high %v1337_v29, %v1337_v29  ;;  %v1361_v63 = vrot.slane %v3495_v52, %v3510_v18 }
 0x785   :  { %v1346_v30 = vcombine.high %v1344_v23, %v1344_v23  ;;  %v1487_v10 = vcombine.low %v1337_v29, %v1345_v37  ;;  %2881 = vmatpush3.bf16.msra.mxu1 %v2880_v25  ;;  %v1369_v7 = vcombine.high %v1361_v63, %v1361_v63 }
 0x786   :  { %2882 = vmatprep.subr.bf16.mxu1 %v3075_v3 }
 0x787   :  { %v1488_v38 = vcombine.low %v1344_v23, %v1346_v30  ;;  %v1495_v16 = vrot.slane %v1487_v10, %v3510_v18 }
 0x789   :  { %v1502_v40 = vrot.slane %v1488_v38, %v3510_v18  ;;  %2884 = vmatpush3.bf16.msra.mxu1 %v2883_v45  ;;  %v3078_v38 = vmov 0  }
 0x78a   :  { %2885 = vmatprep.subr.bf16.mxu1 %v3075_v3  ;;  %2918 = vset.pattern.permute.xlu0 %v3078_v38 }
 0x78b   :  { %v1503_v36 = vcombine.low %v1495_v16, %v1502_v40  ;;  %2919 = vset.pattern.permute.xlu1 %v3078_v38 }
 0x78d   :  { %2887 = vmatpush3.bf16.msra.mxu1 %v2886_v51 }
 0x78e   :  { %2650 = vmatprep.subr.mxu1 %v3073_v2 }
 0x791   :  { %2651 = vmatpush3.msk.msra.mxu1 %vm208_vm3, %v1390_v53 }
 0x84b   :  { %v902_v60 = vpop.f32.mrb[14].mxu1 }
 0x84c   :  { %v906_v61 = vadd.f32 %v902_v60, %v3299_v34  ;;  %v2596_v62 = vpop.f32.mrb[15].mxu1 }
 0x84d   :  { %v1354_v62 = vcombine.high %v3495_v52, %v3495_v52 }
 0x84e   :  { %2936 = vtanh.f32 %v906_v61 }
 0x84f   :  { %v1368_v6 = vrot.slane %v1354_v62, %v3510_v18 }
 0x851   :  { %v1505_v20 = vcombine.low %v1369_v7, %v1368_v6 }
 0x853   :  { %v1519_v30 = vrot.slane %v1505_v20, %v3510_v18 }
 0x858   :  { %v3500_v8 = vpop.eup %2936 }
 0x859   :  { %2624 = vmatmul.mubr.msk.f32.vlgmr.msra.gmra.mrb[8].mxu0 %vm204_vm4, %v3500_v8  ;;  %v1182_v60 = vrot.slane %v3500_v8, %v3327_v50 }
 0x85a   :  { %2890 = vmatpush3.bf16.msra.mxu0 %v2889_v1  ;;  %2681 = vmatprep.mubr.msk.f32.mxu0 %vm3074_vm0, %v3073_v2 }
 0x85b   :  { %2891 = vmatprep.subr.bf16.mxu0 %v3075_v3  ;;  %v1190_v8 = vrot.slane %v1182_v60, %v3327_v50 }
 0x85e   :  { %2893 = vmatpush3.bf16.msra.mxu0 %v2892_v9 }
 0x85f   :  { %2894 = vmatprep.subr.bf16.mxu0 %v3075_v3 }
 0x862   :  { %2896 = vmatpush3.bf16.msra.mxu0 %v2895_v17 }
 0x863   :  { %2897 = vmatprep.subr.bf16.mxu0 %v3075_v3 }
 0x866   :  { %2899 = vmatpush3.bf16.msra.mxu0 %v2898_v24 }
 0x867   :  { %2900 = vmatprep.subr.bf16.mxu0 %v3075_v3 }
 0x86a   :  { %2902 = vmatpush3.bf16.msra.mxu0 %v2901_v32  ;;  %v1370_v32 = vcombine.high %v1368_v6, %v1368_v6 }
 0x86b   :  { %2903 = vmatprep.subr.bf16.mxu0 %v3075_v3 }
 0x86e   :  { %2905 = vmatpush3.bf16.msra.mxu0 %v2904_v39  ;;  %v2140_v39 = vld [vmem:[%s3664_s6] ss:$0 sm:$0xff] }
 0x86f   :  { %2679 = vmatprep.subr.mxu0 %v3073_v2 }
 0x872   :  { %2680 = vmatpush3.msk.msra.mxu0 %vm208_vm3, %v1486_v12 }
 0x873   :  { %2682 = vmatmul.mubr.msk.f32.vlgmr.msra.gmra.mrb[10].mxu0 %vm204_vm4, %v1503_v36 }
 0x874   :  { %2684 = vmatprep.mubr.msk.f32.mxu0 %vm3074_vm0, %v3073_v2 }
 0x92c   :  { %v977_v54 = vpop.f32.mrb[8].mxu0 }
 0x92d   :  { %v982_v55 = vrot.slane %v977_v54, 6  ;;  %v2625_v56 = vpop.f32.mrb[9].mxu0  ;;  %v2147_v54 = vld [vmem:[%s3665_s7] ss:$0 sm:$0xff] }
 0x92f   :  { %v984_v58 = vadd.f32 %v982_v55, %v3299_v34  ;;  %v1183_v34 = vcombine.high %v1182_v60, %v1182_v60 }
 0x931   :  { %2938 = vtanh.f32 %v984_v58  ;;  %v1197_v13 = vrot.slane %v1183_v34, %v3327_v50 }
 0x93b   :  { %v2939_v59 = vpop.eup %2938 }
 0x93c   :  { %v1207_v3 = vrot.slane %v2939_v59, %v3327_v50  ;;  %v1398_v61 = vrot.slane %v2939_v59, 2 }
 0x93e   :  { %v1208_v0 = vcombine.high %v1207_v3, %v1207_v3  ;;  %v1215_v1 = vrot.slane %v1207_v3, %v3327_v50  ;;  %2653 = vmatmul.mubr.msk.f32.vlgmr.msra.gmra.mrb[16].mxu1 %vm204_vm4, %v1398_v61  ;;  %v1772_v61 = vcombine.high %v2147_v54, %v2147_v54 }
 0x940   :  { %v1222_v4 = vrot.slane %v1208_v0, %v3327_v50  ;;  %v1223_v5 = vcombine.high %v1215_v1, %v1215_v1 }
 0x942   :  { %v1224_v9 = vcombine.high %v1222_v4, %v1222_v4  ;;  %v1298_v11 = vrot.slane %v1223_v5, %v3333_v57 }
 0x944   :  { %v3547_v14 = vsel %vm1305_vm5, %v1190_v8, %v1298_v11  ;;  %v1302_v15 = vrot.slane %v1224_v9, %v3333_v57  ;;  %v1779_v8 = vrot.slane %v2147_v54, %v3510_v18  ;;  %v1786_v9 = vrot.slane %v1772_v61, %v3510_v18 }
 0x945   :  { %v1353_v17 = vrot.slane %v3547_v14, %v3510_v18 }
 0x946   :  { %v1604_v21 = vpop.f32.mrb[10].mxu0  ;;  %v3553_v23 = vsel %vm1305_vm5, %v1197_v13, %v1302_v15 }
 0x947   :  { %v2683_v24 = vpop.f32.mrb[11].mxu0  ;;  %v1504_v27 = vcombine.low %v1353_v17, %v1361_v63  ;;  %v1377_v28 = vrot.slane %v3553_v23, %v3510_v18  ;;  %v1621_v36 = vcombine.high %v1604_v21, %v1604_v21  ;;  %v1628_v41 = vrot.slane %v1604_v21, %v3510_v18 }
 0x949   :  { %v1512_v29 = vrot.slane %v1504_v27, %v3510_v18  ;;  %v1521_v35 = vcombine.low %v1370_v32, %v1377_v28  ;;  %v1635_v43 = vrot.slane %v1621_v36, %v3510_v18  ;;  %v1636_v45 = vcombine.high %v1628_v41, %v1628_v41 }
 0x94a   :  { %v1788_v32 = vcombine.high %v1786_v9, %v1786_v9 }
 0x94b   :  { %v1520_v33 = vcombine.low %v1512_v29, %v1519_v30  ;;  %v1528_v37 = vrot.slane %v1521_v35, %v3510_v18  ;;  %v1637_v53 = vcombine.high %v1635_v43, %v1635_v43  ;;  %v1787_v29 = vcombine.high %v1779_v8, %v1779_v8 }
 0x94d   :  { %2685 = vmatmul.mubr.msk.f32.gmra.mrb[12].mxu0 %vm204_vm4, %v1520_v33 }
 0x94e   :  { %2687 = vmatprep.mubr.msk.f32.mxu0 %vm3074_vm0, %v3073_v2 }
 0x951   :  { %2688 = vmatmul.mubr.msk.f32.gmra.mrb[14].mxu0 %vm204_vm4, %v1528_v37 }
 0xa11   :  { %v1470_v10 = vpop.f32.mrb[16].mxu1 }
 0xa12   :  { %v1471_v40 = vadd.f32 %v2140_v39, %v1470_v10  ;;  %v2654_v12 = vpop.f32.mrb[17].mxu1 }
 0xa14   :  { %v1680_v16 = vrot.slane %v1471_v40, %v3327_v50 }
 0xa16   :  { %v1681_v19 = vcombine.high %v1680_v16, %v1680_v16  ;;  %v1688_v2 = vrot.slane %v1680_v16, %v3327_v50 }
 0xa18   :  { %v1695_v42 = vrot.slane %v1681_v19, %v3327_v50  ;;  %v1699_v22 = vrot.slane %v1688_v2, %v3333_v57 }
 0xa1a   :  { %v1703_v25 = vrot.slane %v1695_v42, %v3333_v57  ;;  %v1704_v26 = vcombine.high %v1699_v22, %v1699_v22  ;;  %v1711_v44 = vrot.slane %v1699_v22, %v3510_v18 }
 0xa1c   :  { %v1718_v46 = vrot.slane %v1704_v26, %v3510_v18  ;;  %v1719_v31 = vcombine.high %v1711_v44, %v1711_v44  ;;  %v1746_v51 = vadd.f32 %v1711_v44, %v1628_v41  ;;  %v1721_v58 = vcombine.high %v1703_v25, %v1703_v25 }
 0xa1d   :  { %v1728_v59 = vrot.slane %v1703_v25, %v3510_v18 }
 0xa1e   :  { %v1720_v50 = vcombine.high %v1718_v46, %v1718_v46  ;;  %v1748_v55 = vadd.f32 %v1718_v46, %v1635_v43  ;;  %v1747_v56 = vadd.f32 %v1719_v31, %v1636_v45  ;;  %2940 = vtanh.f32 %v1746_v51 }
 0xa1f   :  { %v1735_v1 = vrot.slane %v1721_v58, %v3510_v18  ;;  %v1736_v5 = vcombine.high %v1728_v59, %v1728_v59 }
 0xa20   :  { %v1749_v60 = vadd.f32 %v1720_v50, %v1637_v53  ;;  %2942 = vtanh.f32 %v1748_v55  ;;  %v1609_v3 = vpop.f32.mrb[12].mxu0 }
 0xa21   :  { %v1638_v62 = vcombine.high %v1609_v3, %v1609_v3  ;;  %v1645_v63 = vrot.slane %v1609_v3, %v3510_v18  ;;  %2944 = vtanh.f32 %v1747_v56  ;;  %v2686_v0 = vpop.f32.mrb[13].mxu0  ;;  %v1737_v21 = vcombine.high %v1735_v1, %v1735_v1 }
 0xa22   :  { %2946 = vtanh.f32 %v1749_v60 }
 0xa23   :  { %v1652_v34 = vrot.slane %v1638_v62, %v3510_v18  ;;  %v1653_v4 = vcombine.high %v1645_v63, %v1645_v63  ;;  %v1750_v6 = vadd.f32 %v1711_v44, %v1645_v63 }
 0xa24   :  { %v1614_v7 = vpop.f32.mrb[14].mxu0 }
 0xa25   :  { %v1654_v11 = vcombine.high %v1652_v34, %v1652_v34  ;;  %v1751_v13 = vadd.f32 %v1728_v59, %v1653_v4  ;;  %v1752_v15 = vadd.f32 %v1736_v5, %v1652_v34  ;;  %2948 = vtanh.f32 %v1750_v6  ;;  %v2689_v17 = vpop.f32.mrb[15].mxu0 }
 0xa26   :  { %v1661_v20 = vrot.slane %v1614_v7, %v3510_v18  ;;  %v1897_v4 = vand.u32 127, %v989_v47 }
 0xa27   :  { %2950 = vtanh.f32 %v1751_v13  ;;  %v1753_v24 = vadd.f32 %v1735_v1, %v1654_v11  ;;  %v2148_v1 = vld [vmem:[#allocation2] ss:$0 sm:$0xff] }
 0xa28   :  { %2952 = vtanh.f32 %v1752_v15  ;;  %v1662_v27 = vcombine.high %v1661_v20, %v1661_v20  ;;  %v1754_v28 = vadd.f32 %v1737_v21, %v1661_v20  ;;  %v2941_v30 = vpop.eup %2940  ;;  %v1902_v5 = vadd.s32 4294967288, %v1897_v4 }
 0xa29   :  { %2954 = vtanh.f32 %v1753_v24  ;;  %v1793_v39 = vmul.f32 %v2941_v30, %v1779_v8 }
 0xa2a   :  { %v2943_v33 = vpop.eup %2942  ;;  %v1755_v35 = vadd.f32 %v1728_v59, %v1662_v27  ;;  %2956 = vtanh.f32 %v1754_v28 }
 0xa2b   :  { %v2945_v37 = vpop.eup %2944  ;;  %v1795_v40 = vmul.f32 %v2943_v33, %v1786_v9  ;;  %v1932_v33 = vsub.s32 1, %v3324_v49 }
 0xa2c   :  { %v2947_v38 = vpop.eup %2946  ;;  %2958 = vtanh.f32 %v1755_v35  ;;  %v1794_v10 = vmul.f32 %v2945_v37, %v1787_v29 }
 0xa2d   :  { %v1796_v12 = vmul.f32 %v2947_v38, %v1788_v32 }
 0xa2e   :  { %v1813_v16 = vcombine.low %v1793_v39, %v1794_v10 }
 0xa2f   :  { %v2949_v36 = vpop.eup %2948  ;;  %v1814_v19 = vcombine.low %v1795_v40, %v1796_v12 }
 0xa30   :  { %v1797_v2 = vmul.f32 %v2949_v36, %v1779_v8  ;;  %v1821_v42 = vrot.slane %v1813_v16, %v3510_v18 }
 0xa31   :  { %v2951_v41 = vpop.eup %2950  ;;  %v1828_v22 = vrot.slane %v1814_v19, %v3510_v18 }
 0xa32   :  { %v2953_v43 = vpop.eup %2952  ;;  %v1836_v25 = vrot.slane %v1797_v2, %v3510_v18  ;;  %v1798_v26 = vmul.f32 %v2951_v41, %v1779_v8 }
 0xa33   :  { %v2955_v44 = vpop.eup %2954  ;;  %v1829_v45 = vcombine.low %v1821_v42, %v1828_v22  ;;  %v1799_v46 = vmul.f32 %v2953_v43, %v1787_v29 }
 0xa34   :  { %v2957_v31 = vpop.eup %2956  ;;  %v1869_v51 = vsel %vm1868_vm10, %v1836_v25, 0.0  ;;  %v1800_v53 = vmul.f32 %v2955_v44, %v1786_v9  ;;  %v3598_v9 = vsub.s32 %v1897_v4, %v3324_v49 }
 0xa35   :  { %1870 = vadd.xlane.f32.xlu0 %v1869_v51  ;;  %v1801_v54 = vmul.f32 %v2957_v31, %v1788_v32  ;;  %v1837_v50 = vcombine.low %v1798_v26, %v1799_v46  ;;  %v1865_v58 = vsel %vm204_vm4, %v1829_v45, 0.0 }
 0xa36   :  { %v2959_v55 = vpop.eup %2958 }
 0xa37   :  { %v1838_v56 = vcombine.low %v1800_v53, %v1801_v54  ;;  %v1845_v59 = vrot.slane %v1837_v50, %v3510_v18  ;;  %v1802_v3 = vmul.f32 %v2959_v55, %v1779_v8  ;;  %v3601_v8 = vsub.s32 %v1902_v5, %v3324_v49 }
 0xa39   :  { %1866 = vadd.xlane.f32.xlu0 %v1865_v58  ;;  %v1852_v60 = vrot.slane %v1838_v56, %v3510_v18  ;;  %v1860_v63 = vrot.slane %v1802_v3, %v3510_v18 }
 0xa3b   :  { %v1853_v61 = vcombine.low %v1845_v59, %v1852_v60  ;;  %v1875_v0 = vsel %vm1868_vm10, %v1860_v63, 0.0 }
 0xa3d   :  { %v1872_v62 = vsel %vm204_vm4, %v1853_v61, 0.0 }
 0xa3e   :  { %1873 = vadd.xlane.f32.xlu1 %v1872_v62 }
 0xa42   :  { %1876 = vadd.xlane.f32.xlu1 %v1875_v0 }
 0xa4f   :  { %1885 = vperm.xlu0 %2918, %v2148_v1  }
 0xac2   :  { %v1871_v34 = vpop.xlane.xlu0 %1870 }
 0xac6   :  { %v1867_v6 = vpop.xlane.xlu0 %1866 }
 0xacb   :  { %v1874_v7 = vpop.xlane.xlu1 %1873 }
 0xace   :  { %v1886_v11 = vpop.permute.xlu0 %1885 }
 0xacf   :  { %v1888_v18 = vadd.f32 %v1886_v11, %v1867_v6  ;;  %v1889_v13 = vadd.f32 %v1886_v11, %v1871_v34  ;;  %v1890_v15 = vadd.f32 %v1886_v11, %v1874_v7  ;;  %v1877_v17 = vpop.xlane.xlu1 %1876 }
 0xad0   :  { %v1891_v20 = vadd.f32 %v1886_v11, %v1877_v17 }
 0xad1   :  { %v1901_v21 = vrot.slane %v1888_v18, %v3598_v9  ;;  %v1906_v47 = vrot.slane %v1889_v13, %v3601_v8  ;;  %v1912_v24 = vrot.slane %v1890_v15, %v3598_v9 }
 0xad2   :  { %v1916_v27 = vrot.slane %v1891_v20, %v3601_v8 }
 0xad3   :  { %v1908_v28 = vsel %vm1907_vm11, %v1906_v47, %v1901_v21 }
 0xad4   :  { %v1917_v29 = vsel %vm1907_vm11, %v1916_v27, %v1912_v24 }
 0xad5   :  { %v1919_v30 = vsel %vm1918_vm12, %v1917_v29, %v1908_v28 }
 0xad6   :  { %v1922_v32 = vsel %vm1921_vm13, %v1919_v30, -inf }
 0xad7   :  { %1923 = vmax.xlane.f32.xlu1 %v1922_v32 }
 0xb64   :  { %v1924_v35 = vpop.xlane.xlu1 %1923 }
 0xb65   :  { %v1929_v37 = vrot.slane %v1924_v35, %v3333_v57  ;;  %v1933_v38 = vrot.slane %v1924_v35, %v1932_v33 }
 0xb67   :  { %v1936_v39 = vsub.f32 %v1888_v18, %v1929_v37  ;;  %v1937_v10 = vsub.f32 %v1889_v13, %v1929_v37  ;;  %v1938_v12 = vsub.f32 %v1890_v15, %v1933_v38  ;;  %v1939_v36 = vsub.f32 %v1891_v20, %v1933_v38  ;;  %v2149_v38 = vld [vmem:[%s3667_s9] ss:$0 sm:$0xff] }
 0xb69   :  { %v1940_v40 = vmul.f32 1.442695, %v1936_v39  ;;  %v1942_v16 = vmul.f32 1.442695, %v1937_v10  ;;  %v1944_v19 = vmul.f32 1.442695, %v1938_v12 }
 0xb6a   :  { %v1946_v2 = vmul.f32 1.442695, %v1939_v36 }
 0xb6b   :  { %2960 = vpow2.f32 %v1940_v40 }
 0xb6c   :  { %2962 = vpow2.f32 %v1942_v16 }
 0xb6d   :  { %2964 = vpow2.f32 %v1944_v19 }
 0xb6e   :  { %2966 = vpow2.f32 %v1946_v2 }
 0xb75   :  { %v2961_v41 = vpop.eup %2960 }
 0xb76   :  { %1953 = vperm.xlu1 %2919, %v2961_v41   ;;  %v2963_v42 = vpop.eup %2962 }
 0xb77   :  { %v2965_v49 = vpop.eup %2964 }
 0xb78   :  { %v2967_v22 = vpop.eup %2966 }
 0xb7a   :  { %1956 = vperm.xlu1 %2919, %v2963_v42  }
 0xb7e   :  { %1959 = vperm.xlu1 %2919, %v2965_v49  }
 0xb82   :  { %1962 = vperm.xlu1 %2919, %v2967_v22  }
 0xbf5   :  { %v1954_v43 = vpop.permute.xlu1 %1953 }
 0xbf6   :  { %v1967_v46 = vrot.slane %v1954_v43, %v3598_v9 }
 0xbf9   :  { %v1957_v25 = vpop.permute.xlu1 %1956 }
 0xbfa   :  { %v1971_v44 = vrot.slane %v1957_v25, %v3601_v8 }
 0xbfc   :  { %v1972_v53 = vsel %vm1907_vm11, %v1971_v44, %v1967_v46 }
 0xbfd   :  { %v1960_v26 = vpop.permute.xlu1 %1959 }
 0xbfe   :  { %v1976_v31 = vrot.slane %v1960_v26, %v3598_v9 }
 0xc01   :  { %v1963_v45 = vpop.permute.xlu1 %1962 }
 0xc02   :  { %v1980_v51 = vrot.slane %v1963_v45, %v3601_v8 }
 0xc04   :  { %v1981_v54 = vsel %vm1907_vm11, %v1980_v51, %v1976_v31 }
 0xc05   :  { %v1982_v50 = vsel %vm1918_vm12, %v1981_v54, %v1972_v53 }
 0xc06   :  { %v1984_v55 = vsel %vm1921_vm13, %v1982_v50, 0.0 }
 0xc07   :  { %1985 = vadd.xlane.f32.xlu1 %v1984_v55 }
 0xc94   :  { %v1986_v56 = vpop.xlane.xlu1 %1985 }
 0xc95   :  { %v1995_v58 = vrot.slane %v1986_v56, %v1932_v33  ;;  %v1991_v59 = vrot.slane %v1986_v56, %v3333_v57 }
 0xc97   :  { %2968 = vrcp.f32 %v1995_v58 }
 0xc98   :  { %2970 = vrcp.f32 %v1991_v59 }
 0xca1   :  { %v2969_v60 = vpop.eup %2968 }
 0xca2   :  { %v2002_v3 = vmul.f32 %v2969_v60, %v2965_v49  ;;  %v2003_v61 = vmul.f32 %v2969_v60, %v2967_v22  ;;  %v2971_v62 = vpop.eup %2970 }
 0xca3   :  { %v1999_v63 = vmul.f32 %v2971_v62, %v2961_v41  ;;  %v2000_v0 = vmul.f32 %v2971_v62, %v2963_v42 }
 0xca4   :  { %2015 = vperm.xlu0 %2918, %v2002_v3  }
 0xca8   :  { %2018 = vperm.xlu0 %2918, %v2003_v61  }
 0xcac   :  { %2009 = vperm.xlu0 %2918, %v1999_v63  }
 0xcb0   :  { %2012 = vperm.xlu0 %2918, %v2000_v0  }
 0xd23   :  { %v2016_v1 = vpop.permute.xlu0 %2015 }
 0xd24   :  { %v2047_v34 = vmul.f32 %v2016_v1, %v3495_v52  ;;  %v2032_v21 = vrot.slane %v2016_v1, %v3598_v9 }
 0xd26   :  { %v2058_v6 = vsel %vm204_vm4, %v2047_v34, 0.0 }
 0xd27   :  { %v2019_v4 = vpop.permute.xlu0 %2018 }
 0xd28   :  { %v2048_v5 = vmul.f32 %v2019_v4, %v3553_v23  ;;  %v2036_v13 = vrot.slane %v2019_v4, %v3601_v8 }
 0xd2a   :  { %v2059_v57 = vsel %vm1868_vm10, %v2048_v5, 0.0  ;;  %v2037_v30 = vsel %vm1907_vm11, %v2036_v13, %v2032_v21 }
 0xd2b   :  { %v2060_v7 = vadd.f32 %v2059_v57, %v2058_v6  ;;  %v2010_v11 = vpop.permute.xlu0 %2009 }
 0xd2c   :  { %v2045_v15 = vmul.f32 %v2010_v11, %v3492_v48  ;;  %v2023_v52 = vrot.slane %v2010_v11, %v3598_v9 }
 0xd2d   :  { %v2061_v18 = vrot.slane %v2060_v7, 4 }
 0xd2e   :  { %v2049_v27 = vsel %vm204_vm4, %v2045_v15, 0.0 }
 0xd2f   :  { %v2062_v17 = vadd.f32 %v2061_v18, %v2060_v7  ;;  %v2013_v20 = vpop.permute.xlu0 %2012 }
 0xd30   :  { %v2027_v47 = vrot.slane %v2013_v20, %v3601_v8  ;;  %v2046_v23 = vmul.f32 %v2013_v20, %v3547_v14 }
 0xd31   :  { %v2063_v24 = vrot.slane %v2062_v17, 2 }
 0xd32   :  { %v2050_v28 = vsel %vm1868_vm10, %v2046_v23, 0.0  ;;  %v2028_v29 = vsel %vm1907_vm11, %v2027_v47, %v2023_v52 }
 0xd33   :  { %v2064_v48 = vadd.f32 %v2063_v24, %v2062_v17  ;;  %v2051_v32 = vadd.f32 %v2050_v28, %v2049_v27  ;;  %v2038_v33 = vsel %vm1918_vm12, %v2037_v30, %v2028_v29 }
 0xd34   :  { %2040 = vst.msk [vmem:[#allocation10] sm:$0x3] %vm1921_vm13, %v2038_v33 }
 0xd35   :  { %v2052_v9 = vrot.slane %v2051_v32, 4  ;;  %v2065_v35 = vrot.slane %v2064_v48, 1 }
 0xd37   :  { %v2053_v8 = vadd.f32 %v2052_v9, %v2051_v32  ;;  %v2066_v14 = vadd.f32 %v2065_v35, %v2064_v48 }
 0xd39   :  { %v2054_v37 = vrot.slane %v2053_v8, 2  ;;  %v2075_v40 = vmul.f32 %v2149_v38, %v2066_v14 }
 0xd3b   :  { %v2055_v39 = vadd.f32 %v2054_v37, %v2053_v8  ;;  %v2078_v36 = vrot.slane %v2075_v40, 7 }
 0xd3d   :  { %v2056_v10 = vrot.slane %v2055_v39, 1 }
 0xd3f   :  { %v2057_v12 = vadd.f32 %v2056_v10, %v2055_v39 }
 0xd41   :  { %v2074_v16 = vmul.f32 %v2149_v38, %v2057_v12 }
 0xd43   :  { %v2079_v19 = vsel %vm1918_vm12, %v2078_v36, %v2074_v16 }
 0xd44   :  { %v2081_v2 = vsel %vm1868_vm10, %v2079_v19, 0.0 }
 0xd45   :  { %2082 = vadd.xlane.f32.xlu0 %v2081_v2 }
 0xd46   :  { %3051 = shalt.err (!%p3048_p0)
}
 0xd47   :  { %s3052_s15 = scalar_lea.hbm %s3669_s12, 32 }
 0xd48   :  { %p3053_p1 = scmp.ne.s32.totalorder %s3669_s12, %s3052_s15  ;;  %p3056_p2 = scmp.lt.u32.totalorder %s3052_s15, %s3669_s12 }
 0xd4a   :  { %p3058_p3 = pnand %p3056_p2, %p3053_p1 }
 0xd4c   :  { %3061 = shalt.err (!%p3058_p3)
}
 0xd4d   :  { %2107 = dma.vmem_to_hbm [thread:$0]  %s2105_s13, 32, %s3669_s12, [#allocation6]   ;;  %v2150_v41 = vld [vmem:[#allocation3] ss:$0 sm:$0xff]  ;;  %vm2094_vm14 = vcmask 1024  }
 0xdd2   :  { %v2083_v42 = vpop.xlane.xlu0 %2082 }
 0xdd3   :  { %v2091_v49 = vadd.f32 %v2150_v41, %v2083_v42 }
 0xdd5   :  { %2972 = vtanh.f32 %v2091_v49 }
 0xddf   :  { %v2973_v22 = vpop.eup %2972 }
 0xde0   :  { %v2093_v43 = vmul.f32 20.0, %v2973_v22 }
 0xde2   :  { %2095 = vst.msk [vmem:[%s3668_s11] sm:$0x3] %vm2094_vm14, %v2093_v43 }
 0xde3   :  { %3066 = dma.done.wait [#allocation6], 32  }
 0xde4   :  { %3067 = vsyncadd [#allocation6], 4294967264 }
 0xde5   :  { %2113 = vsyncpa [#allocation5], 1 }
 0xde6   :  { %2114 = vsyncpa [#allocation8], 1 }
 0xde7   :  { %2115 = vsyncpa [#allocation6], 1 }

</bundles_post_ra>
